<compile_context>
chip_gen: v7x
topology: tpu7x:2x2x1
jax: 0.10.0
libtpu: 0.0.40
codegen_flags: <defaults>
</compile_context>

<pallas_src>
import numpy as np
import jax
import jax.numpy as jnp
from jax.experimental import pallas as pl
from jax.experimental.pallas import tpu as pltpu

# ----------------------------- configuration --------------------------------
BATCH       = 2
RES         = 16           # resolution_vol
N_STEPS     = 8            # n_ray_samples (small synthetic size)
Z_DIM       = 32           # latent-code dim (small synthetic size)
HIDDEN      = 64           # synthetic decoder hidden width
FEAT_DIM    = 16           # synthetic decoder feature dim
DEPTH_RANGE = (0.0, 4.0)
FOV         = 50.0
RADIUS      = 2.0
LAST_DIST   = 10.0         # last_dist in calc_volume_weights
N_POINTS    = RES * RES
N_FLAT      = N_STEPS * N_POINTS   # flattened samples, step-major (s*P + p)


# ============================ fused Pallas kernel ============================
def cnerf_fused_kernel(x_ref, ray_ref, bias_ref, w1t_ref, w2t_ref, b2_ref,
                       out_ref):
    """Fused decoder MLP + calc_volume_weights + feature compositing.

    One grid step == one batch element. Layouts (lane axis last):
      x_ref    : (1, 6, N)     [p; r]^T, N = S*P flattened step-major
      ray_ref  : (1, 3, P)     ray vectors, transposed
      bias_ref : (1, H, 1)     per-batch hidden bias  (z @ Wz + b1)
      w1t_ref  : (H, 6)        [Wp; Wr]^T
      w2t_ref  : (F+1, H)      [Wf, Ws]^T   (combined feat || sigma head)
      b2_ref   : (F+1, 1)      [bf, bs]^T
      out_ref  : (1, F, P)     composited feature map, feature-major
    """
    x = x_ref[0]                                              # (6, N)

    # ---- decoder: single fused input matmul + folded z/bias --------------
    h = jnp.dot(w1t_ref[...], x, preferred_element_type=jnp.float32)
    h = jnp.maximum(h + bias_ref[0], 0.0)                     # (H, N)

    # ---- combined feat||sigma head (one matmul, lane-dense output) -------
    out = (jnp.dot(w2t_ref[...], h, preferred_element_type=jnp.float32)
           + b2_ref[...])                                     # (F+1, N)
    feat = out[:FEAT_DIM, :]                                  # (F, N)  tile-aligned
    sigma = out[FEAT_DIM:FEAT_DIM + 1, :]                     # (1, N)  tile-aligned

    # ---- calc_volume_weights + compositing (lane-dense, P on lanes) ------
    ray = ray_ref[0]                                          # (3, P)
    ray_norm = jnp.sqrt(jnp.sum(ray * ray, axis=0, keepdims=True))   # (1, P)

    # deterministic eval-path depths: di = linspace(d0, d1, S)
    #   => dists[s] = (d1-d0)/(S-1) for s < S-1, LAST_DIST for the last sample
    delta = (DEPTH_RANGE[1] - DEPTH_RANGE[0]) / (N_STEPS - 1)

    acc   = jnp.zeros((FEAT_DIM, N_POINTS), jnp.float32)
    wsum  = jnp.zeros((1, N_POINTS), jnp.float32)
    trans = jnp.ones((1, N_POINTS), jnp.float32)              # exclusive cumprod

    for s in range(N_STEPS):                                  # static, S=8
        lo = s * N_POINTS                                     # lane-aligned (x256)
        dist_s = (delta if s < N_STEPS - 1 else LAST_DIST) * ray_norm   # (1, P)
        sig_s = sigma[:, lo:lo + N_POINTS]                    # (1, P)
        alpha = 1.0 - jnp.exp(-jnp.maximum(sig_s, 0.0) * dist_s)
        w_s = alpha * trans                                   # weights[:, :, s]
        acc = acc + w_s * feat[:, lo:lo + N_POINTS]           # (F, P) FMA
        wsum = wsum + w_s
        trans = trans * (1.0 - alpha + 1e-10)

    out_ref[0] = acc + (1.0 - wsum)                           # (F, P), lane-dense


# ============================ kernel wrapper =================================
def run_cnerf_fused(xT, rayT, bias_col, w1t, w2t, b2col):
    B = xT.shape[0]
    flops = 2 * B * N_FLAT * (6 * HIDDEN + HIDDEN * (FEAT_DIM + 1)) \
            + 8 * B * N_FLAT                                  # compositing VPU work
    bytes_acc = 4 * (xT.size + rayT.size + bias_col.size + w1t.size
                     + w2t.size + b2col.size + B * FEAT_DIM * N_POINTS)
    return pl.pallas_call(
        cnerf_fused_kernel,
        out_shape=jax.ShapeDtypeStruct((B, FEAT_DIM, N_POINTS), jnp.float32),
        grid=(B,),
        in_specs=[
            pl.BlockSpec((1, 6, N_FLAT),        lambda b: (b, 0, 0)),
            pl.BlockSpec((1, 3, N_POINTS),      lambda b: (b, 0, 0)),
            pl.BlockSpec((1, HIDDEN, 1),        lambda b: (b, 0, 0)),
            pl.BlockSpec((HIDDEN, 6),           lambda b: (0, 0)),
            pl.BlockSpec((FEAT_DIM + 1, HIDDEN), lambda b: (0, 0)),
            pl.BlockSpec((FEAT_DIM + 1, 1),     lambda b: (0, 0)),
        ],
        out_specs=pl.BlockSpec((1, FEAT_DIM, N_POINTS), lambda b: (b, 0, 0)),
        compiler_params=pltpu.CompilerParams(dimension_semantics=("parallel",)),
        cost_estimate=pl.CostEstimate(flops=flops,
                                      transcendentals=B * N_FLAT,
                                      bytes_accessed=bytes_acc),
    )(xT, rayT, bias_col, w1t, w2t, b2col)


# ========================= ray / camera glue (plain JAX) =====================
def get_camera_mat(fov):
    focal = 1.0 / np.tan(0.5 * fov * np.pi / 180.0)
    mat = np.array([[focal, 0, 0, 0],
                    [0, focal, 0, 0],
                    [0, 0, 1, 0],
                    [0, 0, 0, 1]], dtype=np.float32)
    return jnp.asarray(mat)[None]            # (1, 4, 4)


def look_at_pose(cam_pos):
    """Camera-to-world 4x4 (look at origin, y-up)."""
    target = np.zeros(3, np.float32)
    up = np.array([0., 1., 0.], np.float32)
    fwd = target - cam_pos
    fwd = fwd / np.linalg.norm(fwd)
    right = np.cross(up, fwd)
    right = right / np.linalg.norm(right)
    up2 = np.cross(fwd, right)
    m = np.eye(4, dtype=np.float32)
    m[:3, 0], m[:3, 1], m[:3, 2], m[:3, 3] = right, up2, fwd, cam_pos
    return m


def arange_pixels(res, batch_size):
    ys, xs = jnp.meshgrid(jnp.arange(res), jnp.arange(res), indexing='ij')
    pix = jnp.stack([xs, ys], axis=-1).reshape(1, -1, 2).astype(jnp.float32)
    pix_scaled = pix / (res - 1) * 2.0 - 1.0
    pixel_loc = jnp.tile(pix, (batch_size, 1, 1))
    pixels = jnp.tile(pix_scaled, (batch_size, 1, 1))
    return pixel_loc, pixels


def image_points_to_world(pixels, camera_mat, world_mat):
    B, N, _ = pixels.shape
    p_hom = jnp.concatenate([pixels, jnp.ones((B, N, 2), jnp.float32)], axis=-1)
    cam_inv = jnp.linalg.inv(camera_mat)
    M = jnp.einsum('bij,bjk->bik', world_mat, cam_inv)
    p_world = jnp.einsum('bij,bnj->bni', M, p_hom)
    return p_world[..., :3]


def origin_to_world(n_points, camera_mat, world_mat):
    origin = jnp.array([0., 0., 0., 1.], jnp.float32)
    cam = jnp.einsum('bij,j->bi', world_mat, origin)[:, :3]
    return jnp.broadcast_to(cam[:, None, :], (world_mat.shape[0], n_points, 3))


def _ray_setup(latent_codes, camera_matrices):
    """Tiny 4x4 matrix algebra -> camera origins and ray directions."""
    B = latent_codes.shape[0]
    camera_mat, world_mat = camera_matrices
    _pixel_loc, pixels = arange_pixels(RES, B)
    pixels = pixels.at[..., -1].multiply(-1.0)                # pixels[..., -1] *= -1
    pixels_world = image_points_to_world(pixels, camera_mat, world_mat)
    camera_world = origin_to_world(N_POINTS, camera_mat, world_mat)
    ray_vector = pixels_world - camera_world
    return camera_world, ray_vector


# ============================== full forward =================================
def cnerf_forward(latent_codes, camera_matrices, params):
    B = latent_codes.shape[0]
    wp, wr, wz, b1, wf, bf, ws, bs = params

    camera_world, ray_vector = _ray_setup(latent_codes, camera_matrices)  # (B,P,3)

    # deterministic depth samples di[s] (eval path)
    di_steps = (DEPTH_RANGE[0]
                + jnp.linspace(0.0, 1.0, N_STEPS).astype(jnp.float32)
                * (DEPTH_RANGE[1] - DEPTH_RANGE[0]))                      # (S,)
    # TODO(synk): training-mode noise (add_noise_to_interval, sigma += randn) and
    # importance sampling (sample_pdf) are omitted; deterministic eval path only.

    # get_evaluation_points, built directly in the kernel's transposed,
    # step-major layout: x[b, :, s*P + p] = [cam + di[s]*ray ; ray]
    camT = jnp.transpose(camera_world, (0, 2, 1))             # (B, 3, P)
    rayT = jnp.transpose(ray_vector, (0, 2, 1))               # (B, 3, P)
    pT = camT[:, :, None, :] + di_steps[None, None, :, None] * rayT[:, :, None, :]
    rT = jnp.broadcast_to(rayT[:, :, None, :], pT.shape)      # (B, 3, S, P)
    xT = jnp.concatenate([pT, rT], axis=1).reshape(B, 6, N_FLAT)

    # fold z through the first layer: per-batch hidden bias = z @ Wz + b1
    bias_col = (latent_codes @ wz + b1)[:, :, None]           # (B, H, 1)
    # stacked / transposed weights for the lane-dense feature-major matmuls
    w1t = jnp.concatenate([wp, wr], axis=0).T                 # (H, 6)
    w2t = jnp.concatenate([wf, ws], axis=1).T                 # (F+1, H)
    b2col = jnp.concatenate([bf, bs], axis=1).T               # (F+1, 1)

    feat_map = run_cnerf_fused(xT, rayT, bias_col, w1t, w2t, b2col)  # (B, F, P)

    # Reference sequence: (B,P,F) -> permute(0,2,1) -> reshape(B,F,res,res)
    #                     -> permute(0,1,3,2).
    # The kernel already emits feature-major (B,F,P), so only the reshape and
    # the final transpose remain (identical bit-layout to the reference).
    feat_map = feat_map.reshape(B, FEAT_DIM, RES, RES)
    feat_map = jnp.transpose(feat_map, (0, 1, 3, 2))
    return feat_map


# ===================== pure-JAX reference (correctness) ======================
def cnerf_forward_ref(latent_codes, camera_matrices, params):
    B = latent_codes.shape[0]
    wp, wr, wz, b1, wf, bf, ws, bs = params
    camera_world, ray_vector = _ray_setup(latent_codes, camera_matrices)

    di = DEPTH_RANGE[0] + jnp.linspace(0.0, 1.0, N_STEPS).reshape(1, 1, -1) \
         * (DEPTH_RANGE[1] - DEPTH_RANGE[0])
    di = jnp.tile(di, (B, N_POINTS, 1)).astype(jnp.float32)           # (B,P,S)

    p = camera_world[:, :, None, :] + di[..., None] * ray_vector[:, :, None, :]
    r = jnp.broadcast_to(ray_vector[:, :, None, :], p.shape)
    p = p.reshape(B, N_POINTS * N_STEPS, 3)
    r = r.reshape(B, N_POINTS * N_STEPS, 3)

    h = jax.nn.relu(p @ wp + r @ wr + (latent_codes @ wz)[:, None, :] + b1)
    feat = (h @ wf + bf).reshape(B, N_POINTS, N_STEPS, FEAT_DIM)
    sigma = (h @ ws + bs).reshape(B, N_POINTS, N_STEPS)

    dists = jnp.concatenate(
        [di[..., 1:] - di[..., :-1], jnp.full_like(di[..., :1], LAST_DIST)], -1)
    dists = dists * jnp.linalg.norm(ray_vector, axis=-1, keepdims=True)
    alpha = 1.0 - jnp.exp(-jax.nn.relu(sigma) * dists)
    trans = jnp.cumprod(
        jnp.concatenate([jnp.ones_like(alpha[..., :1]), 1.0 - alpha + 1e-10], -1),
        axis=-1)[..., :-1]
    weights = alpha * trans
    fmap = jnp.sum(weights[..., None] * feat, axis=-2)
    fmap = fmap + 1.0 - jnp.sum(weights, axis=-1, keepdims=True)      # (B,P,F)
    fmap = jnp.transpose(fmap, (0, 2, 1)).reshape(B, FEAT_DIM, RES, RES)
    return jnp.transpose(fmap, (0, 1, 3, 2))


# ============================ parameter init =================================
def init_decoder_params(key):
    ks = jax.random.split(key, 5)
    s = 0.1
    wp = jax.random.normal(ks[0], (3, HIDDEN), jnp.float32) * s
    wr = jax.random.normal(ks[1], (3, HIDDEN), jnp.float32) * s
    wz = jax.random.normal(ks[2], (Z_DIM, HIDDEN), jnp.float32) * s
    b1 = jnp.zeros((1, HIDDEN), jnp.float32)
    wf = jax.random.normal(ks[3], (HIDDEN, FEAT_DIM), jnp.float32) * s
    bf = jnp.zeros((1, FEAT_DIM), jnp.float32)
    ws = jax.random.normal(ks[4], (HIDDEN, 1), jnp.float32) * s
    bs = jnp.zeros((1, 1), jnp.float32)
    return (wp, wr, wz, b1, wf, bf, ws, bs)


# ================================== main =====================================
if __name__ == "__main__":
    key = jax.random.PRNGKey(0)
    k_z, k_p = jax.random.split(key)

    latent_codes = jax.random.normal(k_z, (BATCH, Z_DIM), jnp.float32)
    params = init_decoder_params(k_p)

    camera_mat = jnp.tile(get_camera_mat(FOV), (BATCH, 1, 1))
    angles = np.array([0.3, 1.1], dtype=np.float32)[:BATCH]
    poses = []
    for a in angles:
        cam_pos = RADIUS * np.array([np.cos(a), 0.3, np.sin(a)], np.float32)
        poses.append(look_at_pose(cam_pos))
    world_mat = jnp.asarray(np.stack(poses, axis=0))

    out = cnerf_forward(latent_codes, (camera_mat, world_mat), params)
    out = jax.block_until_ready(out)

    assert out.shape == (BATCH, FEAT_DIM, RES, RES), out.shape
    assert bool(jnp.all(jnp.isfinite(out)))

    ref = jax.block_until_ready(
        cnerf_forward_ref(latent_codes, (camera_mat, world_mat), params))
    np.testing.assert_allclose(np.asarray(out), np.asarray(ref),
                               rtol=1e-2, atol=1e-2)
    print("KERNEL_OK")
</pallas_src>

<mosaic_0001>
module attributes {stable_mosaic.version = 11 : i64} {
  func.func @cnerf_fused_kernel(%arg0: i32, %arg1: memref<1x6x2048xf32, #tpu.memory_space<vmem>>, %arg2: memref<1x3x256xf32, #tpu.memory_space<vmem>>, %arg3: memref<1x64x1xf32, #tpu.memory_space<vmem>>, %arg4: memref<64x6xf32, #tpu.memory_space<vmem>>, %arg5: memref<17x64xf32, #tpu.memory_space<vmem>>, %arg6: memref<17x1xf32, #tpu.memory_space<vmem>>, %arg7: memref<1x16x256xf32, #tpu.memory_space<vmem>>) attributes {dimension_semantics = [#tpu.dimension_semantics<parallel>], iteration_bounds = array<i64: 2>, scalar_prefetch = 0 : i64, scratch_operands = 0 : i64, tpu.core_type = #tpu.core_type<tc>, window_params = [{transform_indices = @transform_0, window_bounds = array<i64: 1, 6, 2048>}, {transform_indices = @transform_1, window_bounds = array<i64: 1, 3, 256>}, {transform_indices = @transform_2, window_bounds = array<i64: 1, 64, 1>}, {pipeline_mode = #tpu.pipeline_mode<synchronous>, transform_indices = @transform_3, window_bounds = array<i64: 64, 6>}, {pipeline_mode = #tpu.pipeline_mode<synchronous>, transform_indices = @transform_4, window_bounds = array<i64: 17, 64>}, {pipeline_mode = #tpu.pipeline_mode<synchronous>, transform_indices = @transform_5, window_bounds = array<i64: 17, 1>}, {transform_indices = @transform_6, window_bounds = array<i64: 1, 16, 256>}]} {
    %c0 = arith.constant 0 : index
    %c0_0 = arith.constant 0 : index
    %c0_1 = arith.constant 0 : index
    %0 = vector.load %arg1[%c0, %c0_0, %c0_1] : memref<1x6x2048xf32, #tpu.memory_space<vmem>>, vector<1x6x2048xf32>
    %1 = vector.shape_cast %0 : vector<1x6x2048xf32> to vector<6x2048xf32>
    %c0_2 = arith.constant 0 : index
    %c0_3 = arith.constant 0 : index
    %2 = vector.load %arg4[%c0_2, %c0_3] : memref<64x6xf32, #tpu.memory_space<vmem>>, vector<64x6xf32>
    %cst = arith.constant dense<0.000000e+00> : vector<64x2048xf32>
    %3 = tpu.matmul %2, %1, %cst {dimension_numbers = #tpu.dot_dimension_numbers<[1], [0], [0], [1], [0, 0, 1, 1], [], []>} : vector<64x6xf32>, vector<6x2048xf32>, vector<64x2048xf32> -> vector<64x2048xf32>
    %c0_4 = arith.constant 0 : index
    %c0_5 = arith.constant 0 : index
    %c0_6 = arith.constant 0 : index
    %4 = vector.load %arg3[%c0_4, %c0_5, %c0_6] : memref<1x64x1xf32, #tpu.memory_space<vmem>>, vector<1x64x1xf32>
    %5 = vector.shape_cast %4 : vector<1x64x1xf32> to vector<64x1xf32>
    %6 = vector.broadcast %5 : vector<64x1xf32> to vector<64x2048xf32>
    %7 = arith.addf %3, %6 : vector<64x2048xf32>
    %cst_7 = arith.constant 0.000000e+00 : f32
    %8 = vector.broadcast %cst_7 : f32 to vector<64x2048xf32>
    %9 = arith.maximumf %7, %8 : vector<64x2048xf32>
    %c0_8 = arith.constant 0 : index
    %c0_9 = arith.constant 0 : index
    %10 = vector.load %arg5[%c0_8, %c0_9] : memref<17x64xf32, #tpu.memory_space<vmem>>, vector<17x64xf32>
    %cst_10 = arith.constant dense<0.000000e+00> : vector<17x2048xf32>
    %11 = tpu.matmul %10, %9, %cst_10 {dimension_numbers = #tpu.dot_dimension_numbers<[1], [0], [0], [1], [0, 0, 1, 1], [], []>} : vector<17x64xf32>, vector<64x2048xf32>, vector<17x2048xf32> -> vector<17x2048xf32>
    %c0_11 = arith.constant 0 : index
    %c0_12 = arith.constant 0 : index
    %12 = vector.load %arg6[%c0_11, %c0_12] : memref<17x1xf32, #tpu.memory_space<vmem>>, vector<17x1xf32>
    %13 = vector.broadcast %12 : vector<17x1xf32> to vector<17x2048xf32>
    %14 = arith.addf %11, %13 : vector<17x2048xf32>
    %15 = vector.extract_strided_slice %14 {offsets = [0, 0], sizes = [16, 2048], strides = [1, 1]} : vector<17x2048xf32> to vector<16x2048xf32>
    %16 = vector.extract_strided_slice %14 {offsets = [16, 0], sizes = [1, 2048], strides = [1, 1]} : vector<17x2048xf32> to vector<1x2048xf32>
    %c0_13 = arith.constant 0 : index
    %c0_14 = arith.constant 0 : index
    %c0_15 = arith.constant 0 : index
    %17 = vector.load %arg2[%c0_13, %c0_14, %c0_15] : memref<1x3x256xf32, #tpu.memory_space<vmem>>, vector<1x3x256xf32>
    %18 = vector.shape_cast %17 : vector<1x3x256xf32> to vector<3x256xf32>
    %19 = arith.mulf %18, %18 : vector<3x256xf32>
    %cst_16 = arith.constant dense<0.000000e+00> : vector<256xf32>
    %20 = vector.multi_reduction <add>, %19, %cst_16 [0] : vector<3x256xf32> to vector<256xf32>
    %21 = vector.shape_cast %20 : vector<256xf32> to vector<1x256xf32>
    %22 = math.sqrt %21 : vector<1x256xf32>
    %cst_17 = arith.constant 0.000000e+00 : f32
    %23 = vector.broadcast %cst_17 : f32 to vector<16x256xf32>
    %cst_18 = arith.constant 0.000000e+00 : f32
    %24 = vector.broadcast %cst_18 : f32 to vector<1x256xf32>
    %cst_19 = arith.constant 1.000000e+00 : f32
    %25 = vector.broadcast %cst_19 : f32 to vector<1x256xf32>
    %cst_20 = arith.constant 0.571428597 : f32
    %26 = vector.broadcast %cst_20 : f32 to vector<1x256xf32>
    %27 = arith.mulf %26, %22 : vector<1x256xf32>
    %28 = vector.extract_strided_slice %16 {offsets = [0, 0], sizes = [1, 256], strides = [1, 1]} : vector<1x2048xf32> to vector<1x256xf32>
    %cst_21 = arith.constant 0.000000e+00 : f32
    %29 = vector.broadcast %cst_21 : f32 to vector<1x256xf32>
    %30 = arith.maximumf %28, %29 : vector<1x256xf32>
    %cst_22 = arith.constant 0.000000e+00 : f32
    %31 = vector.broadcast %cst_22 : f32 to vector<1x256xf32>
    %32 = arith.subf %31, %30 : vector<1x256xf32>
    %33 = arith.mulf %32, %27 : vector<1x256xf32>
    %34 = math.exp %33 : vector<1x256xf32>
    %cst_23 = arith.constant 1.000000e+00 : f32
    %35 = vector.broadcast %cst_23 : f32 to vector<1x256xf32>
    %36 = arith.subf %35, %34 : vector<1x256xf32>
    %37 = arith.mulf %36, %25 : vector<1x256xf32>
    %38 = vector.extract_strided_slice %15 {offsets = [0, 0], sizes = [16, 256], strides = [1, 1]} : vector<16x2048xf32> to vector<16x256xf32>
    %39 = vector.broadcast %37 : vector<1x256xf32> to vector<16x256xf32>
    %40 = arith.mulf %39, %38 : vector<16x256xf32>
    %41 = arith.addf %23, %40 : vector<16x256xf32>
    %42 = arith.addf %24, %37 : vector<1x256xf32>
    %cst_24 = arith.constant 1.000000e+00 : f32
    %43 = vector.broadcast %cst_24 : f32 to vector<1x256xf32>
    %44 = arith.subf %43, %36 : vector<1x256xf32>
    %cst_25 = arith.constant 1.000000e-10 : f32
    %45 = vector.broadcast %cst_25 : f32 to vector<1x256xf32>
    %46 = arith.addf %44, %45 : vector<1x256xf32>
    %47 = arith.mulf %25, %46 : vector<1x256xf32>
    %cst_26 = arith.constant 0.571428597 : f32
    %48 = vector.broadcast %cst_26 : f32 to vector<1x256xf32>
    %49 = arith.mulf %48, %22 : vector<1x256xf32>
    %50 = vector.extract_strided_slice %16 {offsets = [0, 256], sizes = [1, 256], strides = [1, 1]} : vector<1x2048xf32> to vector<1x256xf32>
    %cst_27 = arith.constant 0.000000e+00 : f32
    %51 = vector.broadcast %cst_27 : f32 to vector<1x256xf32>
    %52 = arith.maximumf %50, %51 : vector<1x256xf32>
    %cst_28 = arith.constant 0.000000e+00 : f32
    %53 = vector.broadcast %cst_28 : f32 to vector<1x256xf32>
    %54 = arith.subf %53, %52 : vector<1x256xf32>
    %55 = arith.mulf %54, %49 : vector<1x256xf32>
    %56 = math.exp %55 : vector<1x256xf32>
    %cst_29 = arith.constant 1.000000e+00 : f32
    %57 = vector.broadcast %cst_29 : f32 to vector<1x256xf32>
    %58 = arith.subf %57, %56 : vector<1x256xf32>
    %59 = arith.mulf %58, %47 : vector<1x256xf32>
    %60 = vector.extract_strided_slice %15 {offsets = [0, 256], sizes = [16, 256], strides = [1, 1]} : vector<16x2048xf32> to vector<16x256xf32>
    %61 = vector.broadcast %59 : vector<1x256xf32> to vector<16x256xf32>
    %62 = arith.mulf %61, %60 : vector<16x256xf32>
    %63 = arith.addf %41, %62 : vector<16x256xf32>
    %64 = arith.addf %42, %59 : vector<1x256xf32>
    %cst_30 = arith.constant 1.000000e+00 : f32
    %65 = vector.broadcast %cst_30 : f32 to vector<1x256xf32>
    %66 = arith.subf %65, %58 : vector<1x256xf32>
    %cst_31 = arith.constant 1.000000e-10 : f32
    %67 = vector.broadcast %cst_31 : f32 to vector<1x256xf32>
    %68 = arith.addf %66, %67 : vector<1x256xf32>
    %69 = arith.mulf %47, %68 : vector<1x256xf32>
    %cst_32 = arith.constant 0.571428597 : f32
    %70 = vector.broadcast %cst_32 : f32 to vector<1x256xf32>
    %71 = arith.mulf %70, %22 : vector<1x256xf32>
    %72 = vector.extract_strided_slice %16 {offsets = [0, 512], sizes = [1, 256], strides = [1, 1]} : vector<1x2048xf32> to vector<1x256xf32>
    %cst_33 = arith.constant 0.000000e+00 : f32
    %73 = vector.broadcast %cst_33 : f32 to vector<1x256xf32>
    %74 = arith.maximumf %72, %73 : vector<1x256xf32>
    %cst_34 = arith.constant 0.000000e+00 : f32
    %75 = vector.broadcast %cst_34 : f32 to vector<1x256xf32>
    %76 = arith.subf %75, %74 : vector<1x256xf32>
    %77 = arith.mulf %76, %71 : vector<1x256xf32>
    %78 = math.exp %77 : vector<1x256xf32>
    %cst_35 = arith.constant 1.000000e+00 : f32
    %79 = vector.broadcast %cst_35 : f32 to vector<1x256xf32>
    %80 = arith.subf %79, %78 : vector<1x256xf32>
    %81 = arith.mulf %80, %69 : vector<1x256xf32>
    %82 = vector.extract_strided_slice %15 {offsets = [0, 512], sizes = [16, 256], strides = [1, 1]} : vector<16x2048xf32> to vector<16x256xf32>
    %83 = vector.broadcast %81 : vector<1x256xf32> to vector<16x256xf32>
    %84 = arith.mulf %83, %82 : vector<16x256xf32>
    %85 = arith.addf %63, %84 : vector<16x256xf32>
    %86 = arith.addf %64, %81 : vector<1x256xf32>
    %cst_36 = arith.constant 1.000000e+00 : f32
    %87 = vector.broadcast %cst_36 : f32 to vector<1x256xf32>
    %88 = arith.subf %87, %80 : vector<1x256xf32>
    %cst_37 = arith.constant 1.000000e-10 : f32
    %89 = vector.broadcast %cst_37 : f32 to vector<1x256xf32>
    %90 = arith.addf %88, %89 : vector<1x256xf32>
    %91 = arith.mulf %69, %90 : vector<1x256xf32>
    %cst_38 = arith.constant 0.571428597 : f32
    %92 = vector.broadcast %cst_38 : f32 to vector<1x256xf32>
    %93 = arith.mulf %92, %22 : vector<1x256xf32>
    %94 = vector.extract_strided_slice %16 {offsets = [0, 768], sizes = [1, 256], strides = [1, 1]} : vector<1x2048xf32> to vector<1x256xf32>
    %cst_39 = arith.constant 0.000000e+00 : f32
    %95 = vector.broadcast %cst_39 : f32 to vector<1x256xf32>
    %96 = arith.maximumf %94, %95 : vector<1x256xf32>
    %cst_40 = arith.constant 0.000000e+00 : f32
    %97 = vector.broadcast %cst_40 : f32 to vector<1x256xf32>
    %98 = arith.subf %97, %96 : vector<1x256xf32>
    %99 = arith.mulf %98, %93 : vector<1x256xf32>
    %100 = math.exp %99 : vector<1x256xf32>
    %cst_41 = arith.constant 1.000000e+00 : f32
    %101 = vector.broadcast %cst_41 : f32 to vector<1x256xf32>
    %102 = arith.subf %101, %100 : vector<1x256xf32>
    %103 = arith.mulf %102, %91 : vector<1x256xf32>
    %104 = vector.extract_strided_slice %15 {offsets = [0, 768], sizes = [16, 256], strides = [1, 1]} : vector<16x2048xf32> to vector<16x256xf32>
    %105 = vector.broadcast %103 : vector<1x256xf32> to vector<16x256xf32>
    %106 = arith.mulf %105, %104 : vector<16x256xf32>
    %107 = arith.addf %85, %106 : vector<16x256xf32>
    %108 = arith.addf %86, %103 : vector<1x256xf32>
    %cst_42 = arith.constant 1.000000e+00 : f32
    %109 = vector.broadcast %cst_42 : f32 to vector<1x256xf32>
    %110 = arith.subf %109, %102 : vector<1x256xf32>
    %cst_43 = arith.constant 1.000000e-10 : f32
    %111 = vector.broadcast %cst_43 : f32 to vector<1x256xf32>
    %112 = arith.addf %110, %111 : vector<1x256xf32>
    %113 = arith.mulf %91, %112 : vector<1x256xf32>
    %cst_44 = arith.constant 0.571428597 : f32
    %114 = vector.broadcast %cst_44 : f32 to vector<1x256xf32>
    %115 = arith.mulf %114, %22 : vector<1x256xf32>
    %116 = vector.extract_strided_slice %16 {offsets = [0, 1024], sizes = [1, 256], strides = [1, 1]} : vector<1x2048xf32> to vector<1x256xf32>
    %cst_45 = arith.constant 0.000000e+00 : f32
    %117 = vector.broadcast %cst_45 : f32 to vector<1x256xf32>
    %118 = arith.maximumf %116, %117 : vector<1x256xf32>
    %cst_46 = arith.constant 0.000000e+00 : f32
    %119 = vector.broadcast %cst_46 : f32 to vector<1x256xf32>
    %120 = arith.subf %119, %118 : vector<1x256xf32>
    %121 = arith.mulf %120, %115 : vector<1x256xf32>
    %122 = math.exp %121 : vector<1x256xf32>
    %cst_47 = arith.constant 1.000000e+00 : f32
    %123 = vector.broadcast %cst_47 : f32 to vector<1x256xf32>
    %124 = arith.subf %123, %122 : vector<1x256xf32>
    %125 = arith.mulf %124, %113 : vector<1x256xf32>
    %126 = vector.extract_strided_slice %15 {offsets = [0, 1024], sizes = [16, 256], strides = [1, 1]} : vector<16x2048xf32> to vector<16x256xf32>
    %127 = vector.broadcast %125 : vector<1x256xf32> to vector<16x256xf32>
    %128 = arith.mulf %127, %126 : vector<16x256xf32>
    %129 = arith.addf %107, %128 : vector<16x256xf32>
    %130 = arith.addf %108, %125 : vector<1x256xf32>
    %cst_48 = arith.constant 1.000000e+00 : f32
    %131 = vector.broadcast %cst_48 : f32 to vector<1x256xf32>
    %132 = arith.subf %131, %124 : vector<1x256xf32>
    %cst_49 = arith.constant 1.000000e-10 : f32
    %133 = vector.broadcast %cst_49 : f32 to vector<1x256xf32>
    %134 = arith.addf %132, %133 : vector<1x256xf32>
    %135 = arith.mulf %113, %134 : vector<1x256xf32>
    %cst_50 = arith.constant 0.571428597 : f32
    %136 = vector.broadcast %cst_50 : f32 to vector<1x256xf32>
    %137 = arith.mulf %136, %22 : vector<1x256xf32>
    %138 = vector.extract_strided_slice %16 {offsets = [0, 1280], sizes = [1, 256], strides = [1, 1]} : vector<1x2048xf32> to vector<1x256xf32>
    %cst_51 = arith.constant 0.000000e+00 : f32
    %139 = vector.broadcast %cst_51 : f32 to vector<1x256xf32>
    %140 = arith.maximumf %138, %139 : vector<1x256xf32>
    %cst_52 = arith.constant 0.000000e+00 : f32
    %141 = vector.broadcast %cst_52 : f32 to vector<1x256xf32>
    %142 = arith.subf %141, %140 : vector<1x256xf32>
    %143 = arith.mulf %142, %137 : vector<1x256xf32>
    %144 = math.exp %143 : vector<1x256xf32>
    %cst_53 = arith.constant 1.000000e+00 : f32
    %145 = vector.broadcast %cst_53 : f32 to vector<1x256xf32>
    %146 = arith.subf %145, %144 : vector<1x256xf32>
    %147 = arith.mulf %146, %135 : vector<1x256xf32>
    %148 = vector.extract_strided_slice %15 {offsets = [0, 1280], sizes = [16, 256], strides = [1, 1]} : vector<16x2048xf32> to vector<16x256xf32>
    %149 = vector.broadcast %147 : vector<1x256xf32> to vector<16x256xf32>
    %150 = arith.mulf %149, %148 : vector<16x256xf32>
    %151 = arith.addf %129, %150 : vector<16x256xf32>
    %152 = arith.addf %130, %147 : vector<1x256xf32>
    %cst_54 = arith.constant 1.000000e+00 : f32
    %153 = vector.broadcast %cst_54 : f32 to vector<1x256xf32>
    %154 = arith.subf %153, %146 : vector<1x256xf32>
    %cst_55 = arith.constant 1.000000e-10 : f32
    %155 = vector.broadcast %cst_55 : f32 to vector<1x256xf32>
    %156 = arith.addf %154, %155 : vector<1x256xf32>
    %157 = arith.mulf %135, %156 : vector<1x256xf32>
    %cst_56 = arith.constant 0.571428597 : f32
    %158 = vector.broadcast %cst_56 : f32 to vector<1x256xf32>
    %159 = arith.mulf %158, %22 : vector<1x256xf32>
    %160 = vector.extract_strided_slice %16 {offsets = [0, 1536], sizes = [1, 256], strides = [1, 1]} : vector<1x2048xf32> to vector<1x256xf32>
    %cst_57 = arith.constant 0.000000e+00 : f32
    %161 = vector.broadcast %cst_57 : f32 to vector<1x256xf32>
    %162 = arith.maximumf %160, %161 : vector<1x256xf32>
    %cst_58 = arith.constant 0.000000e+00 : f32
    %163 = vector.broadcast %cst_58 : f32 to vector<1x256xf32>
    %164 = arith.subf %163, %162 : vector<1x256xf32>
    %165 = arith.mulf %164, %159 : vector<1x256xf32>
    %166 = math.exp %165 : vector<1x256xf32>
    %cst_59 = arith.constant 1.000000e+00 : f32
    %167 = vector.broadcast %cst_59 : f32 to vector<1x256xf32>
    %168 = arith.subf %167, %166 : vector<1x256xf32>
    %169 = arith.mulf %168, %157 : vector<1x256xf32>
    %170 = vector.extract_strided_slice %15 {offsets = [0, 1536], sizes = [16, 256], strides = [1, 1]} : vector<16x2048xf32> to vector<16x256xf32>
    %171 = vector.broadcast %169 : vector<1x256xf32> to vector<16x256xf32>
    %172 = arith.mulf %171, %170 : vector<16x256xf32>
    %173 = arith.addf %151, %172 : vector<16x256xf32>
    %174 = arith.addf %152, %169 : vector<1x256xf32>
    %cst_60 = arith.constant 1.000000e+00 : f32
    %175 = vector.broadcast %cst_60 : f32 to vector<1x256xf32>
    %176 = arith.subf %175, %168 : vector<1x256xf32>
    %cst_61 = arith.constant 1.000000e-10 : f32
    %177 = vector.broadcast %cst_61 : f32 to vector<1x256xf32>
    %178 = arith.addf %176, %177 : vector<1x256xf32>
    %179 = arith.mulf %157, %178 : vector<1x256xf32>
    %cst_62 = arith.constant 1.000000e+01 : f32
    %180 = vector.broadcast %cst_62 : f32 to vector<1x256xf32>
    %181 = arith.mulf %180, %22 : vector<1x256xf32>
    %182 = vector.extract_strided_slice %16 {offsets = [0, 1792], sizes = [1, 256], strides = [1, 1]} : vector<1x2048xf32> to vector<1x256xf32>
    %cst_63 = arith.constant 0.000000e+00 : f32
    %183 = vector.broadcast %cst_63 : f32 to vector<1x256xf32>
    %184 = arith.maximumf %182, %183 : vector<1x256xf32>
    %cst_64 = arith.constant 0.000000e+00 : f32
    %185 = vector.broadcast %cst_64 : f32 to vector<1x256xf32>
    %186 = arith.subf %185, %184 : vector<1x256xf32>
    %187 = arith.mulf %186, %181 : vector<1x256xf32>
    %188 = math.exp %187 : vector<1x256xf32>
    %cst_65 = arith.constant 1.000000e+00 : f32
    %189 = vector.broadcast %cst_65 : f32 to vector<1x256xf32>
    %190 = arith.subf %189, %188 : vector<1x256xf32>
    %191 = arith.mulf %190, %179 : vector<1x256xf32>
    %192 = vector.extract_strided_slice %15 {offsets = [0, 1792], sizes = [16, 256], strides = [1, 1]} : vector<16x2048xf32> to vector<16x256xf32>
    %193 = vector.broadcast %191 : vector<1x256xf32> to vector<16x256xf32>
    %194 = arith.mulf %193, %192 : vector<16x256xf32>
    %195 = arith.addf %173, %194 : vector<16x256xf32>
    %196 = arith.addf %174, %191 : vector<1x256xf32>
    %cst_66 = arith.constant 1.000000e+00 : f32
    %197 = vector.broadcast %cst_66 : f32 to vector<1x256xf32>
    %198 = arith.subf %197, %196 : vector<1x256xf32>
    %199 = vector.broadcast %198 : vector<1x256xf32> to vector<16x256xf32>
    %200 = arith.addf %195, %199 : vector<16x256xf32>
    %c0_67 = arith.constant 0 : index
    %c0_68 = arith.constant 0 : index
    %c0_69 = arith.constant 0 : index
    %201 = vector.load %arg7[%c0_67, %c0_68, %c0_69] : memref<1x16x256xf32, #tpu.memory_space<vmem>>, vector<1x16x256xf32>
    %202 = vector.shape_cast %201 : vector<1x16x256xf32> to vector<16x256xf32>
    %203 = vector.shape_cast %200 : vector<16x256xf32> to vector<1x16x256xf32>
    tpu.vector_store %arg7[%c0_67, %c0_68, %c0_69], %203 {strides = array<i32>} : memref<1x16x256xf32, #tpu.memory_space<vmem>>, vector<1x16x256xf32>,
    return
  }
  func.func @transform_0(%arg0: i32) -> (i32, i32, i32) {
    %c0_i32 = arith.constant 0 : i32
    %c0_i32_0 = arith.constant 0 : i32
    %c0_i32_1 = arith.constant 0 : i32
    return %arg0, %c0_i32, %c0_i32_0 : i32, i32, i32
  }
  func.func @transform_1(%arg0: i32) -> (i32, i32, i32) {
    %c0_i32 = arith.constant 0 : i32
    %c0_i32_0 = arith.constant 0 : i32
    %c0_i32_1 = arith.constant 0 : i32
    return %arg0, %c0_i32, %c0_i32_0 : i32, i32, i32
  }
  func.func @transform_2(%arg0: i32) -> (i32, i32, i32) {
    %c0_i32 = arith.constant 0 : i32
    %c0_i32_0 = arith.constant 0 : i32
    %c0_i32_1 = arith.constant 0 : i32
    return %arg0, %c0_i32, %c0_i32_0 : i32, i32, i32
  }
  func.func @transform_3(%arg0: i32) -> (i32, i32) {
    %c0_i32 = arith.constant 0 : i32
    %c0_i32_0 = arith.constant 0 : i32
    %c0_i32_1 = arith.constant 0 : i32
    return %c0_i32, %c0_i32_0 : i32, i32
  }
  func.func @transform_4(%arg0: i32) -> (i32, i32) {
    %c0_i32 = arith.constant 0 : i32
    %c0_i32_0 = arith.constant 0 : i32
    %c0_i32_1 = arith.constant 0 : i32
    return %c0_i32, %c0_i32_0 : i32, i32
  }
  func.func @transform_5(%arg0: i32) -> (i32, i32) {
    %c0_i32 = arith.constant 0 : i32
    %c0_i32_0 = arith.constant 0 : i32
    %c0_i32_1 = arith.constant 0 : i32
    return %c0_i32, %c0_i32_0 : i32, i32
  }
  func.func @transform_6(%arg0: i32) -> (i32, i32, i32) {
    %c0_i32 = arith.constant 0 : i32
    %c0_i32_0 = arith.constant 0 : i32
    %c0_i32_1 = arith.constant 0 : i32
    return %arg0, %c0_i32, %c0_i32_0 : i32, i32, i32
  }
}

</mosaic_0001>

<bundles_post_ra>
// kernel: tpu_custom_call.1
= control target key start
LH: loop header
LB: loop body
LE: loop exit
PB: predicated region body
PF: predicated region fallthrough
CT: control target
= control target key end

     0   :  { %11 = vsyncpa [#allocation3], 0  ;;  %s3916_s0 = inlined_call_operand.vmem [shape: f32[2,6,2048], index: 0, kind: input, shape index: {}]   ;;  %s3917_s1 = inlined_call_operand.vmem [shape: f32[2,3,256], index: 1, kind: input, shape index: {}]   ;;  %s3918_s2 = inlined_call_operand.vmem [shape: f32[2,64,1], index: 2, kind: input, shape index: {}]   ;;  %s3919_s3 = inlined_call_operand.vmem [shape: f32[64,6], index: 3, kind: input, shape index: {}]   ;;  %s3920_s4 = inlined_call_operand.vmem [shape: f32[17,64], index: 4, kind: input, shape index: {}]   ;;  %s3921_s5 = inlined_call_operand.vmem [shape: f32[17,1], index: 5, kind: input, shape index: {}]   ;;  %s3922_s6 = inlined_call_operand.hbm [shape: f32[2,16,256], index: 6, kind: output, shape index: {}]  }
   0x1   :  { %13 = vsyncpa [#allocation3 + $0x1], 0  ;;  %s3050_s21 = smov 0   ;;  %s3052_s22 = smov 0  }
   0x2   :  { %s3054_s23 = smov 0   ;;  %s3056_s24 = smov 0  }
   0x3 LB: > { %s3071_s25 = sadd.s32 4294967295, %s3008_s24   ;;  %s2613_s26 = sadd.s32 4294967294, %s3008_s24   ;;  %s3008_s24 = sphi %s3056_s24, %s3928_s24   ;;  %s3004_s23 = sphi %s3054_s23, %s3927_s23   ;;  %s3000_s22 = sphi %s3052_s22, %s3926_s22   ;;  %s2996_s21 = sphi %s3050_s21, %s3925_s21  }
   0x4   : > { %s3075_s27 = sadd.s32 1, %s3008_s24   ;;  %s167_s28 = sadd.s32 1, %s3004_s23 }
   0x5   : > { %s164_s29 = ssub.s32 %s3008_s24, %s3075_s27  ;;  %p177_p0 = scmp.ne.s32.totalorder %s3004_s23, %s3000_s22 }
   0x6   : > { %p165_p1 = scmp.eq.s32.totalorder %s164_s29, 0  ;;  %p178_p2 = scmp.eq.s32.totalorder %s3071_s25, 1 }
   0x7   : > { %p183_p3 = scmp.ne.s32.totalorder %s3000_s22, %s2996_s21  ;;  %p184_p4 = scmp.eq.s32.totalorder %s2613_s26, 1 }
   0x8   : > { %s3086_s30 = scalar_select %p165_p1, %s3004_s23, %s167_s28  }
   0x9   : > { %p3088_p5 = por %p178_p2, %p177_p0  ;;  %p3092_p6 = por %p184_p4, %p183_p3 }
   0xa   : > { %p2616_p7 = scmp.ge.s32.totalorder %s3008_s24, 1  ;;  %p235_p8 = scmp.lt.s32.totalorder %s3008_s24, 3 }
   0xc   : > { %p236_p9 = pnand %p2616_p7, %p235_p8 }
   0xd   : > { %p275_p10 = scmp.lt.s32.totalorder (!%p236_p9), %s3071_s25, 1  ;;  %v3010_v0 = vmov (!%p236_p9), 0.0   ;;  %v3011_v1 = vmov (!%p236_p9), 0   ;;  %vm387_vm0 = vcmask (!%p236_p9), 1045504   ;;  %v3113_v2 = vld [vmem:[%s3919_s3] sm:$0xff] (!%p236_p9)  ;;  %vm362_vm1 = vcmask (!%p236_p9), 48128  }
   0xe   : > { %239 = sbr.rel (%p236_p9) target bundleno = 650 (0x28a), region = 44  ;;  %500 = vmatprep.mubr.f32.mxu0 (!%p236_p9), %v3010_v0  ;;  %613 = vmatprep.mubr.f32.mxu1 (!%p236_p9), %v3010_v0  ;;  %v3142_v11 = vld [vmem:[%s3919_s3 + $0x8] sm:$0xff] (!%p236_p9)  ;;  %v3161_v16 = vld [vmem:[%s3919_s3 + $0x10] sm:$0xff] (!%p236_p9)  ;;  %v3176_v19 = vld [vmem:[%s3919_s3 + $0x18] sm:$0xff] (!%p236_p9)  ;;  %vm1489_vm2 = vcmask (!%p236_p9), 523264   ;;  %vm2168_vm3 = vcmask (!%p236_p9), 1042432  }
   0xf   : > { %2908 = vset.pattern.permute.xlu0 (!%p236_p9), %v3011_v1  ;;  %2909 = vset.pattern.permute.xlu1 (!%p236_p9), %v3011_v1  ;;  %v3189_v22 = vld [vmem:[%s3919_s3 + $0x20] sm:$0xff] (!%p236_p9)  ;;  %v3202_v25 = vld [vmem:[%s3919_s3 + $0x28] sm:$0xff] (!%p236_p9)  ;;  %v1473_v26 = vld [vmem:[%s3921_s5 + $0x10] sm:$0x1] (!%p236_p9)  ;;  %s3012_s17 = smov (!%p236_p9), [#allocation2]  }
  0x10   : > { %v1471_v27 = vld [vmem:[%s3921_s5] sm:$0xff] (!%p236_p9)  ;;  %v3219_v28 = vld [vmem:[%s3919_s3 + $0x30] sm:$0xff] (!%p236_p9)  ;;  %v1472_v29 = vld [vmem:[%s3921_s5 + $0x8] sm:$0xff] (!%p236_p9)  ;;  %s2950_s18 = sshll.u32 (!%p236_p9), %s3012_s17, 4  ;;  %s2951_s18 = int_to_ptr.vmem [resolvable:$false] %s2950_s18 }
  0x11   : > { %v3233_v30 = vld [vmem:[%s3919_s3 + $0x38] sm:$0xff] (!%p236_p9) }
  0x15   : > { %s3102_s9 = scalar_select %p275_p10, %s3071_s25, 1 }
  0x17   : > { %s2733_s10 = sshll.u32 %s3102_s9, 7  ;;  %s2735_s16 = sshll.u32 %s3102_s9, 6 }
  0x18   : > { %s3108_s13 = scalar_lea.vmem %s3916_s0, %s2733_s10  ;;  %s3135_s19 = scalar_lea.vmem %s3918_s2, %s2735_s16 }
  0x19   : > { %v291_v3 = vld [vmem:[%s3108_s13 + $0x8] sm:$0x3f]  ;;  %v293_v4 = vld [vmem:[%s3108_s13 + $0x18] sm:$0x3f]  ;;  %v290_v5 = vld [vmem:[%s3108_s13] sm:$0x3f] }
  0x1a   : > { %2624 = vmatprep.subr.msk.mxu0 %vm387_vm0, %v291_v3  ;;  %2634 = vmatprep.subr.msk.mxu1 %vm387_vm0, %v293_v4  ;;  %v292_v6 = vld [vmem:[%s3108_s13 + $0x10] sm:$0x3f]  ;;  %v295_v7 = vld [vmem:[%s3108_s13 + $0x28] sm:$0x3f]  ;;  %v294_v8 = vld [vmem:[%s3108_s13 + $0x20] sm:$0x3f] }
  0x1b   : > { %2625 = vmatpush1.msk.msra.mxu0 %vm387_vm0, %v290_v5  ;;  %2635 = vmatpush1.msk.msra.mxu1 %vm387_vm0, %v292_v6  ;;  %v297_v9 = vld [vmem:[%s3108_s13 + $0x38] sm:$0x3f]  ;;  %v299_v10 = vld [vmem:[%s3108_s13 + $0x48] sm:$0x3f]  ;;  %v296_v12 = vld [vmem:[%s3108_s13 + $0x30] sm:$0x3f] }
  0x1c   : > { %2626 = vmatmul.mubr.msk.f32.vlgmr.msra.gmra.mrb[0].mxu0 %vm362_vm1, %v3113_v2  ;;  %2636 = vmatmul.mubr.msk.f32.vlgmr.msra.gmra.mrb[0].mxu1 %vm362_vm1, %v3113_v2  ;;  %v314_v13 = vld [vmem:[%s3135_s19] sm:$0xff]  ;;  %v301_v14 = vld [vmem:[%s3108_s13 + $0x58] sm:$0x3f]  ;;  %v316_v15 = vld [vmem:[%s3135_s19 + $0x10] sm:$0xff]  ;;  %s2736_s10 = sshll.u32 %s3071_s25, 9 }
  0x1d   : > { %2644 = vmatprep.subr.msk.mxu0 %vm387_vm0, %v295_v7  ;;  %506 = vmatprep.mubr.f32.mxu0 %v3010_v0  ;;  %v315_v17 = vld [vmem:[%s3135_s19 + $0x8] sm:$0xff]  ;;  %v317_v18 = vld [vmem:[%s3135_s19 + $0x18] sm:$0xff]  ;;  %v318_v20 = vld [vmem:[%s3135_s19 + $0x20] sm:$0xff]  ;;  %s3869_s15 = scalar_lea.hbm %s3922_s6, %s2736_s10 }
  0x1e   : > { %2645 = vmatpush1.msk.msra.mxu0 %vm387_vm0, %v294_v8  ;;  %619 = vmatprep.mubr.f32.mxu1 %v3010_v0  ;;  %v319_v21 = vld [vmem:[%s3135_s19 + $0x28] sm:$0xff]  ;;  %v320_v23 = vld [vmem:[%s3135_s19 + $0x30] sm:$0xff]  ;;  %v321_v24 = vld [vmem:[%s3135_s19 + $0x38] sm:$0xff]  ;;  %s2734_s19 = sshll.u32 %s3102_s9, 3  ;;  %s272_s9 = sand.u32 1, %s3000_s22  }
  0x1f   : > { %2654 = vmatprep.subr.msk.mxu1 %vm387_vm0, %v297_v9  ;;  %2664 = vmatprep.subr.msk.mxu0 %vm387_vm0, %v299_v10  ;;  %v298_v31 = vld [vmem:[%s3108_s13 + $0x40] sm:$0x3f]  ;;  %v300_v32 = vld [vmem:[%s3108_s13 + $0x50] sm:$0x3f]  ;;  %v303_v33 = vld [vmem:[%s3108_s13 + $0x68] sm:$0x3f]  ;;  %s284_s28 = scalar_lea.vmem %s3917_s1, %s2734_s19 }
  0x20   : > { %2627 = vmatmul.mubr.msk.f32.gmra.mrb[2].mxu0 %vm362_vm1, %v3142_v11  ;;  %2637 = vmatmul.mubr.msk.f32.gmra.mrb[2].mxu1 %vm362_vm1, %v3142_v11  ;;  %v305_v34 = vld [vmem:[%s3108_s13 + $0x78] sm:$0x3f]  ;;  %v302_v35 = vld [vmem:[%s3108_s13 + $0x60] sm:$0x3f]  ;;  %v304_v36 = vld [vmem:[%s3108_s13 + $0x70] sm:$0x3f] }
  0x21   : > { %512 = vmatprep.mubr.f32.mxu0 %v3010_v0  ;;  %625 = vmatprep.mubr.f32.mxu1 %v3010_v0  ;;  %s2617_s29 = sshll.u32 %s272_s9, 5  ;;  %s3875_s25 = scalar_lea.sflag [#allocation3], %s272_s9 }
  0x22   : > { %2655 = vmatpush1.msk.msra.mxu1 %vm387_vm0, %v296_v12  ;;  %324 = vperm.xlu0 %2908, %v314_v13   ;;  %s274_s11 = scalar_lea.vmem [#allocation2], %s2617_s29  ;;  %s2952_s19 = scalar_lea.vmem %s2951_s18, 1024 }
  0x23   : > { %2674 = vmatprep.subr.msk.mxu1 %vm387_vm0, %v301_v14  ;;  %334 = vperm.xlu1 %2909, %v316_v15   ;;  %s2527_s12 = sshll.u32 %s274_s11, 4  ;;  %s3871_s12 = int_to_ptr.vmem [resolvable:$true] %s2527_s12 }
  0x24   : > { %2628 = vmatmul.mubr.msk.f32.gmra.mrb[4].mxu0 %vm362_vm1, %v3161_v16  ;;  %2638 = vmatmul.mubr.msk.f32.gmra.mrb[4].mxu1 %vm362_vm1, %v3161_v16  ;;  %s2946_s16 = scalar_lea.vmem %s3871_s12, 512  ;;  %p2953_p0 = scmp.lt.s32.totalorder %s3871_s12, %s2951_s18 }
  0x25   : > { %518 = vmatprep.mubr.f32.mxu0 %v3010_v0  ;;  %631 = vmatprep.mubr.f32.mxu1 %v3010_v0  ;;  %p2947_p11 = scmp.ne.s32.totalorder %s3871_s12, %s2946_s16  ;;  %p2954_p1 = scmp.lt.s32.totalorder %s2952_s19, %s2946_s16 }
  0x26   : > { %329 = vperm.xlu0 %2908, %v315_v17  }
  0x27   : > { %339 = vperm.xlu1 %2909, %v317_v18   ;;  %p2948_p12 = pnand %p2947_p11, %p3088_p5  ;;  %p2955_p2 = por %p2954_p1, %p2953_p0 }
  0x28   : > { %2629 = vmatmul.mubr.msk.f32.gmra.mrb[6].mxu0 %vm362_vm1, %v3176_v19  ;;  %2639 = vmatmul.mubr.msk.f32.gmra.mrb[6].mxu1 %vm362_vm1, %v3176_v19 }
  0x29   : > { %524 = vmatprep.mubr.f32.mxu0 %v3010_v0  ;;  %637 = vmatprep.mubr.f32.mxu1 %v3010_v0  ;;  %p2949_p13 = pneg %p2948_p12 }
  0x2a   : > { %344 = vperm.xlu0 %2908, %v318_v20  }
  0x2b   : > { %349 = vperm.xlu1 %2909, %v319_v21   ;;  %p2956_p3 = pnand %p2955_p2, %p2949_p13 }
  0x2c   : > { %2630 = vmatmul.mubr.msk.f32.gmra.mrb[8].mxu0 %vm362_vm1, %v3189_v22  ;;  %2640 = vmatmul.mubr.msk.f32.gmra.mrb[8].mxu1 %vm362_vm1, %v3189_v22 }
  0x2d   : > { %530 = vmatprep.mubr.f32.mxu0 %v3010_v0  ;;  %643 = vmatprep.mubr.f32.mxu1 %v3010_v0 }
  0x2e   : > { %354 = vperm.xlu0 %2908, %v320_v23  }
  0x2f   : > { %359 = vperm.xlu1 %2909, %v321_v24  }
  0x30   : > { %2631 = vmatmul.mubr.msk.f32.gmra.mrb[10].mxu0 %vm362_vm1, %v3202_v25  ;;  %2641 = vmatmul.mubr.msk.f32.gmra.mrb[10].mxu1 %vm362_vm1, %v3202_v25 }
  0x31   : > { %536 = vmatprep.mubr.f32.mxu0 %v3010_v0  ;;  %649 = vmatprep.mubr.f32.mxu1 %v3010_v0 }
  0x32   : > { %1486 = vperm.xlu0 %2908, %v1473_v26  }
  0x33   : > { %1476 = vperm.xlu1 %2909, %v1471_v27  }
  0x34   : > { %2632 = vmatmul.mubr.msk.f32.gmra.mrb[12].mxu0 %vm362_vm1, %v3219_v28  ;;  %2642 = vmatmul.mubr.msk.f32.gmra.mrb[12].mxu1 %vm362_vm1, %v3219_v28 }
  0x35   : > { %542 = vmatprep.mubr.f32.mxu0 %v3010_v0  ;;  %655 = vmatprep.mubr.f32.mxu1 %v3010_v0 }
  0x36   : > { %1481 = vperm.xlu0 %2908, %v1472_v29  }
  0x38   : > { %2633 = vmatmul.mubr.msk.f32.gmra.mrb[14].mxu0 %vm362_vm1, %v3233_v30  ;;  %2643 = vmatmul.mubr.msk.f32.gmra.mrb[14].mxu1 %vm362_vm1, %v3233_v30 }
  0x39   : > { %726 = vmatprep.mubr.f32.mxu0 %v3010_v0  ;;  %839 = vmatprep.mubr.f32.mxu1 %v3010_v0 }
  0x3c   : > { %2646 = vmatmul.mubr.msk.f32.vlgmr.msra.gmra.mrb[16].mxu0 %vm362_vm1, %v3113_v2  ;;  %2656 = vmatmul.mubr.msk.f32.vlgmr.msra.gmra.mrb[16].mxu1 %vm362_vm1, %v3113_v2 }
  0x3d   : > { %2665 = vmatpush1.msk.msra.mxu0 %vm387_vm0, %v298_v31  ;;  %732 = vmatprep.mubr.f32.mxu0 %v3010_v0 }
  0x3e   : > { %845 = vmatprep.mubr.f32.mxu1 %v3010_v0  ;;  %2675 = vmatpush1.msk.msra.mxu1 %vm387_vm0, %v300_v32 }
  0x3f   : > { %2684 = vmatprep.subr.msk.mxu0 %vm387_vm0, %v303_v33  ;;  %2694 = vmatprep.subr.msk.mxu1 %vm387_vm0, %v305_v34 }
  0x40   : > { %2647 = vmatmul.mubr.msk.f32.gmra.mrb[18].mxu0 %vm362_vm1, %v3142_v11  ;;  %2657 = vmatmul.mubr.msk.f32.gmra.mrb[18].mxu1 %vm362_vm1, %v3142_v11 }
  0x41   : > { %738 = vmatprep.mubr.f32.mxu0 %v3010_v0  ;;  %851 = vmatprep.mubr.f32.mxu1 %v3010_v0 }
  0x44   : > { %2648 = vmatmul.mubr.msk.f32.gmra.mrb[20].mxu0 %vm362_vm1, %v3161_v16  ;;  %2658 = vmatmul.mubr.msk.f32.gmra.mrb[20].mxu1 %vm362_vm1, %v3161_v16 }
  0x45   : > { %744 = vmatprep.mubr.f32.mxu0 %v3010_v0  ;;  %857 = vmatprep.mubr.f32.mxu1 %v3010_v0 }
  0x48   : > { %2649 = vmatmul.mubr.msk.f32.gmra.mrb[22].mxu0 %vm362_vm1, %v3176_v19  ;;  %2659 = vmatmul.mubr.msk.f32.gmra.mrb[22].mxu1 %vm362_vm1, %v3176_v19 }
  0x49   : > { %750 = vmatprep.mubr.f32.mxu0 %v3010_v0  ;;  %863 = vmatprep.mubr.f32.mxu1 %v3010_v0 }
  0x4c   : > { %2650 = vmatmul.mubr.msk.f32.gmra.mrb[24].mxu0 %vm362_vm1, %v3189_v22  ;;  %2660 = vmatmul.mubr.msk.f32.gmra.mrb[24].mxu1 %vm362_vm1, %v3189_v22 }
  0x4d   : > { %756 = vmatprep.mubr.f32.mxu0 %v3010_v0  ;;  %869 = vmatprep.mubr.f32.mxu1 %v3010_v0 }
  0x50   : > { %2651 = vmatmul.mubr.msk.f32.gmra.mrb[26].mxu0 %vm362_vm1, %v3202_v25  ;;  %2661 = vmatmul.mubr.msk.f32.gmra.mrb[26].mxu1 %vm362_vm1, %v3202_v25 }
  0x51   : > { %762 = vmatprep.mubr.f32.mxu0 %v3010_v0  ;;  %875 = vmatprep.mubr.f32.mxu1 %v3010_v0 }
  0x54   : > { %2652 = vmatmul.mubr.msk.f32.gmra.mrb[28].mxu0 %vm362_vm1, %v3219_v28  ;;  %2662 = vmatmul.mubr.msk.f32.gmra.mrb[28].mxu1 %vm362_vm1, %v3219_v28 }
  0x55   : > { %768 = vmatprep.mubr.f32.mxu0 %v3010_v0  ;;  %881 = vmatprep.mubr.f32.mxu1 %v3010_v0 }
  0x58   : > { %2653 = vmatmul.mubr.msk.f32.gmra.mrb[30].mxu0 %vm362_vm1, %v3233_v30  ;;  %2663 = vmatmul.mubr.msk.f32.gmra.mrb[30].mxu1 %vm362_vm1, %v3233_v30 }
  0x59   : > { %952 = vmatprep.mubr.f32.mxu0 %v3010_v0  ;;  %1065 = vmatprep.mubr.f32.mxu1 %v3010_v0 }
  0x5c   : > { %2666 = vmatmul.mubr.msk.f32.vlgmr.msra.gmra.mrb[32].mxu0 %vm362_vm1, %v3113_v2  ;;  %2676 = vmatmul.mubr.msk.f32.vlgmr.msra.gmra.mrb[32].mxu1 %vm362_vm1, %v3113_v2 }
  0x5d   : > { %2685 = vmatpush1.msk.msra.mxu0 %vm387_vm0, %v302_v35  ;;  %958 = vmatprep.mubr.f32.mxu0 %v3010_v0 }
  0x5e   : > { %1071 = vmatprep.mubr.f32.mxu1 %v3010_v0  ;;  %2695 = vmatpush1.msk.msra.mxu1 %vm387_vm0, %v304_v36 }
  0x60   : > { %2667 = vmatmul.mubr.msk.f32.gmra.mrb[34].mxu0 %vm362_vm1, %v3142_v11  ;;  %2677 = vmatmul.mubr.msk.f32.gmra.mrb[34].mxu1 %vm362_vm1, %v3142_v11 }
  0x61   : > { %964 = vmatprep.mubr.f32.mxu0 %v3010_v0  ;;  %1077 = vmatprep.mubr.f32.mxu1 %v3010_v0 }
  0x64   : > { %2668 = vmatmul.mubr.msk.f32.gmra.mrb[36].mxu0 %vm362_vm1, %v3161_v16  ;;  %2678 = vmatmul.mubr.msk.f32.gmra.mrb[36].mxu1 %vm362_vm1, %v3161_v16 }
  0x65   : > { %970 = vmatprep.mubr.f32.mxu0 %v3010_v0  ;;  %1083 = vmatprep.mubr.f32.mxu1 %v3010_v0 }
  0x68   : > { %2669 = vmatmul.mubr.msk.f32.gmra.mrb[38].mxu0 %vm362_vm1, %v3176_v19  ;;  %2679 = vmatmul.mubr.msk.f32.gmra.mrb[38].mxu1 %vm362_vm1, %v3176_v19 }
  0x69   : > { %976 = vmatprep.mubr.f32.mxu0 %v3010_v0  ;;  %1089 = vmatprep.mubr.f32.mxu1 %v3010_v0 }
  0x6c   : > { %2670 = vmatmul.mubr.msk.f32.gmra.mrb[40].mxu0 %vm362_vm1, %v3189_v22  ;;  %2680 = vmatmul.mubr.msk.f32.gmra.mrb[40].mxu1 %vm362_vm1, %v3189_v22 }
  0x6d   : > { %982 = vmatprep.mubr.f32.mxu0 %v3010_v0  ;;  %1095 = vmatprep.mubr.f32.mxu1 %v3010_v0 }
  0x70   : > { %2671 = vmatmul.mubr.msk.f32.gmra.mrb[42].mxu0 %vm362_vm1, %v3202_v25  ;;  %2681 = vmatmul.mubr.msk.f32.gmra.mrb[42].mxu1 %vm362_vm1, %v3202_v25 }
  0x71   : > { %988 = vmatprep.mubr.f32.mxu0 %v3010_v0  ;;  %1101 = vmatprep.mubr.f32.mxu1 %v3010_v0 }
  0x74   : > { %2672 = vmatmul.mubr.msk.f32.gmra.mrb[44].mxu0 %vm362_vm1, %v3219_v28  ;;  %2682 = vmatmul.mubr.msk.f32.gmra.mrb[44].mxu1 %vm362_vm1, %v3219_v28 }
  0x75   : > { %994 = vmatprep.mubr.f32.mxu0 %v3010_v0  ;;  %1107 = vmatprep.mubr.f32.mxu1 %v3010_v0 }
  0x78   : > { %2673 = vmatmul.mubr.msk.f32.gmra.mrb[46].mxu0 %vm362_vm1, %v3233_v30  ;;  %2683 = vmatmul.mubr.msk.f32.gmra.mrb[46].mxu1 %vm362_vm1, %v3233_v30 }
  0x79   : > { %1178 = vmatprep.mubr.f32.mxu0 %v3010_v0  ;;  %1291 = vmatprep.mubr.f32.mxu1 %v3010_v0 }
  0x7c   : > { %2686 = vmatmul.mubr.msk.f32.vlgmr.msra.gmra.mrb[48].mxu0 %vm362_vm1, %v3113_v2  ;;  %2696 = vmatmul.mubr.msk.f32.vlgmr.msra.gmra.mrb[48].mxu1 %vm362_vm1, %v3113_v2 }
  0x7d   : > { %1184 = vmatprep.mubr.f32.mxu0 %v3010_v0  ;;  %1297 = vmatprep.mubr.f32.mxu1 %v3010_v0 }
  0x80   : > { %2687 = vmatmul.mubr.msk.f32.gmra.mrb[50].mxu0 %vm362_vm1, %v3142_v11  ;;  %2697 = vmatmul.mubr.msk.f32.gmra.mrb[50].mxu1 %vm362_vm1, %v3142_v11 }
  0x81   : > { %1190 = vmatprep.mubr.f32.mxu0 %v3010_v0  ;;  %1303 = vmatprep.mubr.f32.mxu1 %v3010_v0 }
  0x84   : > { %2688 = vmatmul.mubr.msk.f32.gmra.mrb[52].mxu0 %vm362_vm1, %v3161_v16  ;;  %2698 = vmatmul.mubr.msk.f32.gmra.mrb[52].mxu1 %vm362_vm1, %v3161_v16 }
  0x85   : > { %1196 = vmatprep.mubr.f32.mxu0 %v3010_v0  ;;  %1309 = vmatprep.mubr.f32.mxu1 %v3010_v0 }
  0x88   : > { %2689 = vmatmul.mubr.msk.f32.gmra.mrb[54].mxu0 %vm362_vm1, %v3176_v19  ;;  %2699 = vmatmul.mubr.msk.f32.gmra.mrb[54].mxu1 %vm362_vm1, %v3176_v19 }
  0x89   : > { %1202 = vmatprep.mubr.f32.mxu0 %v3010_v0  ;;  %1315 = vmatprep.mubr.f32.mxu1 %v3010_v0 }
  0x8c   : > { %2690 = vmatmul.mubr.msk.f32.gmra.mrb[56].mxu0 %vm362_vm1, %v3189_v22  ;;  %2700 = vmatmul.mubr.msk.f32.gmra.mrb[56].mxu1 %vm362_vm1, %v3189_v22 }
  0x8d   : > { %1208 = vmatprep.mubr.f32.mxu0 %v3010_v0  ;;  %1321 = vmatprep.mubr.f32.mxu1 %v3010_v0 }
  0x90   : > { %2691 = vmatmul.mubr.msk.f32.gmra.mrb[58].mxu0 %vm362_vm1, %v3202_v25  ;;  %2701 = vmatmul.mubr.msk.f32.gmra.mrb[58].mxu1 %vm362_vm1, %v3202_v25 }
  0x91   : > { %1214 = vmatprep.mubr.f32.mxu0 %v3010_v0  ;;  %1327 = vmatprep.mubr.f32.mxu1 %v3010_v0 }
  0x94   : > { %2692 = vmatmul.mubr.msk.f32.gmra.mrb[60].mxu0 %vm362_vm1, %v3219_v28  ;;  %2702 = vmatmul.mubr.msk.f32.gmra.mrb[60].mxu1 %vm362_vm1, %v3219_v28 }
  0x95   : > { %1220 = vmatprep.mubr.f32.mxu0 %v3010_v0  ;;  %1333 = vmatprep.mubr.f32.mxu1 %v3010_v0 }
  0x98   : > { %2693 = vmatmul.mubr.msk.f32.gmra.mrb[62].mxu0 %vm362_vm1, %v3233_v30  ;;  %2703 = vmatmul.mubr.msk.f32.gmra.mrb[62].mxu1 %vm362_vm1, %v3233_v30 }
  0x99   : > { %1563 = vmatprep.mubr.f32.mxu0 %v3010_v0  ;;  %1646 = vmatprep.mubr.f32.mxu1 %v3010_v0 }
  0xa1   : > { %v3397_v37 = vpop.permute.xlu0 %324 }
  0xa2   : > { %v3404_v46 = vpop.permute.xlu1 %334 }
  0xa5   : > { %v3400_v43 = vpop.permute.xlu0 %329 }
  0xa6   : > { %v3412_v10 = vpop.permute.xlu1 %339 }
  0xa9   : > { %v3421_v27 = vpop.permute.xlu0 %344 }
  0xef   : > { %v502_v38 = vpop.f32.mrb[0].mxu0  ;;  %v615_v39 = vpop.f32.mrb[0].mxu1 }
  0xf0   : > { %v504_v40 = vpop.f32.mrb[1].mxu0  ;;  %v616_v41 = vadd.f32 %v615_v39, %v3397_v37  ;;  %v617_v42 = vpop.f32.mrb[1].mxu1  ;;  %v503_v45 = vadd.f32 %v502_v38, %v3397_v37 }
  0xf1   : > { %v618_v44 = vadd.f32 %v617_v42, %v3397_v37  ;;  %v505_v47 = vadd.f32 %v504_v40, %v3397_v37 }
  0xf2   : > { %v1342_v50 = vmax.f32 %v616_v41, 0.0  ;;  %v1340_v58 = vmax.f32 %v503_v45, 0.0  ;;  %v3424_v41 = vpop.permute.xlu1 %349 }
  0xf3   : > { %v508_v48 = vpop.f32.mrb[2].mxu0  ;;  %v621_v49 = vpop.f32.mrb[2].mxu1  ;;  %v1343_v55 = vmax.f32 %v618_v44, 0.0  ;;  %v1341_v61 = vmax.f32 %v505_v47, 0.0 }
  0xf4   : > { %v509_v51 = vadd.f32 %v508_v48, %v3400_v43  ;;  %v510_v52 = vpop.f32.mrb[3].mxu0  ;;  %v622_v53 = vadd.f32 %v621_v49, %v3400_v43  ;;  %v623_v54 = vpop.f32.mrb[3].mxu1 }
  0xf5   : > { %v511_v56 = vadd.f32 %v510_v52, %v3400_v43  ;;  %v624_v57 = vadd.f32 %v623_v54, %v3400_v43 }
  0xf6   : > { %v1356_v59 = vmax.f32 %v509_v51, 0.0  ;;  %v1358_v60 = vmax.f32 %v622_v53, 0.0 }
  0xf7   : > { %v1357_v62 = vmax.f32 %v511_v56, 0.0  ;;  %v1359_v63 = vmax.f32 %v624_v57, 0.0  ;;  %v514_v1 = vpop.f32.mrb[4].mxu0  ;;  %v627_v2 = vpop.f32.mrb[4].mxu1 }
  0xf8   : > { %v2739_v3 = vpack.c.bf16 %v1356_v59, %v1340_v58  ;;  %v2755_v4 = vpack.c.bf16 %v1358_v60, %v1342_v50  ;;  %v516_v5 = vpop.f32.mrb[5].mxu0  ;;  %v628_v6 = vadd.f32 %v627_v2, %v3404_v46  ;;  %v629_v7 = vpop.f32.mrb[5].mxu1  ;;  %v515_v12 = vadd.f32 %v514_v1, %v3404_v46 }
  0xf9   : > { %v2737_v8 = vpack.c.bf16 %v1357_v62, %v1341_v61  ;;  %v2753_v9 = vpack.c.bf16 %v1359_v63, %v1343_v55  ;;  %v630_v11 = vadd.f32 %v629_v7, %v3404_v46  ;;  %v517_v13 = vadd.f32 %v516_v5, %v3404_v46  ;;  %v3433_v60 = vpop.permute.xlu0 %354 }
  0xfa   : > { %v1374_v16 = vmax.f32 %v628_v6, 0.0  ;;  %v1372_v24 = vmax.f32 %v515_v12, 0.0  ;;  %v3437_v12 = vpop.permute.xlu1 %359 }
  0xfb   : > { %v520_v14 = vpop.f32.mrb[6].mxu0  ;;  %2738 = vmatprep.subr.bf16.mxu0 %v2737_v8  ;;  %v633_v15 = vpop.f32.mrb[6].mxu1  ;;  %2754 = vmatprep.subr.bf16.mxu1 %v2753_v9  ;;  %v1375_v21 = vmax.f32 %v630_v11, 0.0  ;;  %v1373_v28 = vmax.f32 %v517_v13, 0.0 }
  0xfc   : > { %v521_v17 = vadd.f32 %v520_v14, %v3412_v10  ;;  %v522_v18 = vpop.f32.mrb[7].mxu0  ;;  %v634_v19 = vadd.f32 %v633_v15, %v3412_v10  ;;  %2740 = vmatpush1.bf16.msra.mxu0 %v2739_v3  ;;  %v635_v20 = vpop.f32.mrb[7].mxu1  ;;  %2756 = vmatpush1.bf16.msra.mxu1 %v2755_v4 }
  0xfd   : > { %v523_v22 = vadd.f32 %v522_v18, %v3412_v10  ;;  %v636_v23 = vadd.f32 %v635_v20, %v3412_v10 }
  0xfe   : > { %v1388_v25 = vmax.f32 %v521_v17, 0.0  ;;  %v1390_v26 = vmax.f32 %v634_v19, 0.0 }
  0xff   : > { %v1389_v29 = vmax.f32 %v523_v22, 0.0  ;;  %v1391_v30 = vmax.f32 %v636_v23, 0.0  ;;  %v526_v31 = vpop.f32.mrb[8].mxu0  ;;  %v639_v32 = vpop.f32.mrb[8].mxu1 }
 0x100   : > { %v2743_v33 = vpack.c.bf16 %v1388_v25, %v1372_v24  ;;  %v2759_v34 = vpack.c.bf16 %v1390_v26, %v1374_v16  ;;  %v528_v35 = vpop.f32.mrb[9].mxu0  ;;  %v640_v36 = vadd.f32 %v639_v32, %v3421_v27  ;;  %v641_v38 = vpop.f32.mrb[9].mxu1  ;;  %v527_v44 = vadd.f32 %v526_v31, %v3421_v27 }
 0x101   : > { %v2741_v39 = vpack.c.bf16 %v1389_v29, %v1373_v28  ;;  %v2757_v40 = vpack.c.bf16 %v1391_v30, %v1375_v21  ;;  %v642_v42 = vadd.f32 %v641_v38, %v3421_v27  ;;  %v529_v45 = vadd.f32 %v528_v35, %v3421_v27 }
 0x102   : > { %v1406_v49 = vmax.f32 %v640_v36, 0.0  ;;  %v1404_v57 = vmax.f32 %v527_v44, 0.0 }
 0x103   : > { %v532_v47 = vpop.f32.mrb[10].mxu0  ;;  %2742 = vmatprep.subr.bf16.mxu0 %v2741_v39  ;;  %v645_v48 = vpop.f32.mrb[10].mxu1  ;;  %2758 = vmatprep.subr.bf16.mxu1 %v2757_v40  ;;  %v1407_v54 = vmax.f32 %v642_v42, 0.0  ;;  %v1405_v61 = vmax.f32 %v529_v45, 0.0 }
 0x104   : > { %v533_v50 = vadd.f32 %v532_v47, %v3424_v41  ;;  %v534_v51 = vpop.f32.mrb[11].mxu0  ;;  %v646_v52 = vadd.f32 %v645_v48, %v3424_v41  ;;  %2744 = vmatpush1.bf16.msra.mxu0 %v2743_v33  ;;  %v647_v53 = vpop.f32.mrb[11].mxu1  ;;  %2760 = vmatpush1.bf16.msra.mxu1 %v2759_v34 }
 0x105   : > { %v535_v55 = vadd.f32 %v534_v51, %v3424_v41  ;;  %v648_v56 = vadd.f32 %v647_v53, %v3424_v41 }
 0x106   : > { %v1420_v58 = vmax.f32 %v533_v50, 0.0  ;;  %v1422_v59 = vmax.f32 %v646_v52, 0.0 }
 0x107   : > { %v1421_v62 = vmax.f32 %v535_v55, 0.0  ;;  %v1423_v63 = vmax.f32 %v648_v56, 0.0  ;;  %v538_v1 = vpop.f32.mrb[12].mxu0  ;;  %v651_v2 = vpop.f32.mrb[12].mxu1  ;;  %v3454_v55 = vld [vmem:[%s3920_s4] sm:$0xff] }
 0x108   : > { %v2747_v3 = vpack.c.bf16 %v1420_v58, %v1404_v57  ;;  %v2763_v4 = vpack.c.bf16 %v1422_v59, %v1406_v49  ;;  %v540_v5 = vpop.f32.mrb[13].mxu0  ;;  %v652_v6 = vadd.f32 %v651_v2, %v3433_v60  ;;  %v653_v7 = vpop.f32.mrb[13].mxu1  ;;  %v539_v13 = vadd.f32 %v538_v1, %v3433_v60 }
 0x109   : > { %v2745_v8 = vpack.c.bf16 %v1421_v62, %v1405_v61  ;;  %v2761_v9 = vpack.c.bf16 %v1423_v63, %v1407_v54  ;;  %v654_v11 = vadd.f32 %v653_v7, %v3433_v60  ;;  %v541_v14 = vadd.f32 %v540_v5, %v3433_v60 }
 0x10a   : > { %v1438_v17 = vmax.f32 %v652_v6, 0.0  ;;  %v1436_v25 = vmax.f32 %v539_v13, 0.0 }
 0x10b   : > { %v544_v15 = vpop.f32.mrb[14].mxu0  ;;  %v657_v16 = vpop.f32.mrb[14].mxu1  ;;  %2746 = vmatprep.subr.bf16.mxu0 %v2745_v8  ;;  %2762 = vmatprep.subr.bf16.mxu1 %v2761_v9  ;;  %v1439_v22 = vmax.f32 %v654_v11, 0.0  ;;  %v1437_v29 = vmax.f32 %v541_v14, 0.0  ;;  %v3467_v11 = vld [vmem:[%s3920_s4 + $0x8] sm:$0xff] }
 0x10c   : > { %v545_v18 = vadd.f32 %v544_v15, %v3437_v12  ;;  %v658_v19 = vadd.f32 %v657_v16, %v3437_v12  ;;  %v546_v20 = vpop.f32.mrb[15].mxu0  ;;  %v659_v21 = vpop.f32.mrb[15].mxu1  ;;  %2748 = vmatpush1.bf16.msra.mxu0 %v2747_v3  ;;  %2764 = vmatpush1.bf16.msra.mxu1 %v2763_v4 }
 0x10d   : > { %v547_v23 = vadd.f32 %v546_v20, %v3437_v12  ;;  %v660_v24 = vadd.f32 %v659_v21, %v3437_v12 }
 0x10e   : > { %v1452_v26 = vmax.f32 %v545_v18, 0.0  ;;  %v1454_v28 = vmax.f32 %v658_v19, 0.0 }
 0x10f   : > { %v1453_v30 = vmax.f32 %v547_v23, 0.0  ;;  %v1455_v31 = vmax.f32 %v660_v24, 0.0  ;;  %v728_v32 = vpop.f32.mrb[16].mxu0  ;;  %v841_v33 = vpop.f32.mrb[16].mxu1 }
 0x110   : > { %v2751_v34 = vpack.c.bf16 %v1452_v26, %v1436_v25  ;;  %v2767_v35 = vpack.c.bf16 %v1454_v28, %v1438_v17  ;;  %v730_v36 = vpop.f32.mrb[17].mxu0  ;;  %v842_v38 = vadd.f32 %v841_v33, %v3397_v37  ;;  %v843_v39 = vpop.f32.mrb[17].mxu1  ;;  %v729_v45 = vadd.f32 %v728_v32, %v3397_v37  ;;  %v3482_v25 = vld [vmem:[%s3920_s4 + $0x10] sm:$0x1] }
 0x111   : > { %v2749_v40 = vpack.c.bf16 %v1453_v30, %v1437_v29  ;;  %v2765_v42 = vpack.c.bf16 %v1455_v31, %v1439_v22  ;;  %v844_v44 = vadd.f32 %v843_v39, %v3397_v37  ;;  %v731_v47 = vadd.f32 %v730_v36, %v3397_v37 }
 0x112   : > { %v1346_v50 = vmax.f32 %v842_v38, 0.0  ;;  %v1344_v59 = vmax.f32 %v729_v45, 0.0 }
 0x113   : > { %v734_v48 = vpop.f32.mrb[18].mxu0  ;;  %2750 = vmatprep.subr.bf16.mxu0 %v2749_v40  ;;  %2766 = vmatprep.subr.bf16.mxu1 %v2765_v42  ;;  %v847_v49 = vpop.f32.mrb[18].mxu1  ;;  %v1347_v56 = vmax.f32 %v844_v44, 0.0  ;;  %v1345_v63 = vmax.f32 %v731_v47, 0.0 }
 0x114   : > { %v735_v51 = vadd.f32 %v734_v48, %v3400_v43  ;;  %v736_v52 = vpop.f32.mrb[19].mxu0  ;;  %v848_v53 = vadd.f32 %v847_v49, %v3400_v43  ;;  %2752 = vmatpush1.bf16.msra.mxu0 %v2751_v34  ;;  %2768 = vmatpush1.bf16.msra.mxu1 %v2767_v35  ;;  %v849_v54 = vpop.f32.mrb[19].mxu1 }
 0x115   : > { %v737_v57 = vadd.f32 %v736_v52, %v3400_v43  ;;  %v850_v58 = vadd.f32 %v849_v54, %v3400_v43 }
 0x116   : > { %v1360_v61 = vmax.f32 %v735_v51, 0.0  ;;  %v1362_v62 = vmax.f32 %v848_v53, 0.0 }
 0x117   : > { %v1361_v1 = vmax.f32 %v737_v57, 0.0  ;;  %v1363_v2 = vmax.f32 %v850_v58, 0.0  ;;  %v740_v3 = vpop.f32.mrb[20].mxu0  ;;  %2704 = vmatmul.mubr.msk.f32.vlgmr.msra.gmra.mrb[64].mxu0 %vm1489_vm2, %v3454_v55  ;;  %2707 = vmatmul.mubr.msk.f32.vlgmr.msra.gmra.mrb[64].mxu1 %vm1489_vm2, %v3454_v55  ;;  %v853_v4 = vpop.f32.mrb[20].mxu1 }
 0x118   : > { %v2771_v5 = vpack.c.bf16 %v1360_v61, %v1344_v59  ;;  %v2787_v6 = vpack.c.bf16 %v1362_v62, %v1346_v50  ;;  %v742_v7 = vpop.f32.mrb[21].mxu0  ;;  %v854_v8 = vadd.f32 %v853_v4, %v3404_v46  ;;  %1569 = vmatprep.mubr.f32.mxu0 %v3010_v0  ;;  %v855_v9 = vpop.f32.mrb[21].mxu1  ;;  %1652 = vmatprep.mubr.f32.mxu1 %v3010_v0 }
 0x119   : > { %v2769_v13 = vpack.c.bf16 %v1361_v1, %v1345_v63  ;;  %v2785_v14 = vpack.c.bf16 %v1363_v2, %v1347_v56  ;;  %v856_v15 = vadd.f32 %v855_v9, %v3404_v46  ;;  %v741_v16 = vadd.f32 %v740_v3, %v3404_v46 }
 0x11a   : > { %v743_v17 = vadd.f32 %v742_v7, %v3404_v46  ;;  %v1378_v20 = vmax.f32 %v854_v8, 0.0 }
 0x11b   : > { %v746_v18 = vpop.f32.mrb[22].mxu0  ;;  %2705 = vmatmul.mubr.msk.f32.gmra.mrb[66].mxu0 %vm1489_vm2, %v3467_v11  ;;  %2708 = vmatmul.mubr.msk.f32.gmra.mrb[66].mxu1 %vm1489_vm2, %v3467_v11  ;;  %v859_v19 = vpop.f32.mrb[22].mxu1  ;;  %v1379_v26 = vmax.f32 %v856_v15, 0.0  ;;  %v1376_v30 = vmax.f32 %v741_v16, 0.0 }
 0x11c   : > { %v747_v21 = vadd.f32 %v746_v18, %v3412_v10  ;;  %2770 = vmatprep.subr.bf16.mxu0 %v2769_v13  ;;  %v748_v22 = vpop.f32.mrb[23].mxu0  ;;  %v860_v23 = vadd.f32 %v859_v19, %v3412_v10  ;;  %2786 = vmatprep.subr.bf16.mxu1 %v2785_v14  ;;  %v861_v24 = vpop.f32.mrb[23].mxu1  ;;  %v1377_v33 = vmax.f32 %v743_v17, 0.0 }
 0x11d   : > { %v749_v28 = vadd.f32 %v748_v22, %v3412_v10  ;;  %2772 = vmatpush1.bf16.msra.mxu0 %v2771_v5  ;;  %v862_v29 = vadd.f32 %v861_v24, %v3412_v10  ;;  %2788 = vmatpush1.bf16.msra.mxu1 %v2787_v6 }
 0x11e   : > { %v1392_v31 = vmax.f32 %v747_v21, 0.0  ;;  %v1394_v32 = vmax.f32 %v860_v23, 0.0  ;;  %1575 = vmatprep.mubr.f32.mxu0 %v3010_v0  ;;  %1658 = vmatprep.mubr.f32.mxu1 %v3010_v0 }
 0x11f   : > { %v1393_v34 = vmax.f32 %v749_v28, 0.0  ;;  %v1395_v35 = vmax.f32 %v862_v29, 0.0  ;;  %v752_v36 = vpop.f32.mrb[24].mxu0  ;;  %v865_v38 = vpop.f32.mrb[24].mxu1  ;;  %2706 = vmatmul.mubr.msk.f32.gmra.mrb[68].mxu0 %vm1489_vm2, %v3482_v25  ;;  %2709 = vmatmul.mubr.msk.f32.gmra.mrb[68].mxu1 %vm1489_vm2, %v3482_v25 }
 0x120   : > { %v2775_v39 = vpack.c.bf16 %v1392_v31, %v1376_v30  ;;  %v2791_v40 = vpack.c.bf16 %v1394_v32, %v1378_v20  ;;  %v866_v42 = vadd.f32 %v865_v38, %v3421_v27  ;;  %v754_v44 = vpop.f32.mrb[25].mxu0  ;;  %v867_v45 = vpop.f32.mrb[25].mxu1  ;;  %1729 = vmatprep.mubr.f32.mxu0 %v3010_v0  ;;  %1812 = vmatprep.mubr.f32.mxu1 %v3010_v0 }
 0x121   : > { %v2773_v47 = vpack.c.bf16 %v1393_v34, %v1377_v33  ;;  %v2789_v48 = vpack.c.bf16 %v1395_v35, %v1379_v26  ;;  %v868_v49 = vadd.f32 %v867_v45, %v3421_v27  ;;  %v753_v50 = vadd.f32 %v752_v36, %v3421_v27 }
 0x122   : > { %v755_v51 = vadd.f32 %v754_v44, %v3421_v27  ;;  %v1410_v54 = vmax.f32 %v866_v42, 0.0 }
 0x123   : > { %v758_v52 = vpop.f32.mrb[26].mxu0  ;;  %v871_v53 = vpop.f32.mrb[26].mxu1  ;;  %2774 = vmatprep.subr.bf16.mxu0 %v2773_v47  ;;  %2790 = vmatprep.subr.bf16.mxu1 %v2789_v48  ;;  %v1411_v61 = vmax.f32 %v868_v49, 0.0  ;;  %v1408_v1 = vmax.f32 %v753_v50, 0.0 }
 0x124   : > { %v759_v56 = vadd.f32 %v758_v52, %v3424_v41  ;;  %v872_v57 = vadd.f32 %v871_v53, %v3424_v41  ;;  %v760_v58 = vpop.f32.mrb[27].mxu0  ;;  %v873_v59 = vpop.f32.mrb[27].mxu1  ;;  %2776 = vmatpush1.bf16.msra.mxu0 %v2775_v39  ;;  %2792 = vmatpush1.bf16.msra.mxu1 %v2791_v40  ;;  %v1409_v4 = vmax.f32 %v755_v51, 0.0 }
 0x125   : > { %v761_v62 = vadd.f32 %v760_v58, %v3424_v41  ;;  %v874_v63 = vadd.f32 %v873_v59, %v3424_v41 }
 0x126   : > { %v1424_v2 = vmax.f32 %v759_v56, 0.0  ;;  %v1426_v3 = vmax.f32 %v872_v57, 0.0 }
 0x127   : > { %v1425_v5 = vmax.f32 %v761_v62, 0.0  ;;  %v1427_v6 = vmax.f32 %v874_v63, 0.0  ;;  %v764_v7 = vpop.f32.mrb[28].mxu0  ;;  %v877_v8 = vpop.f32.mrb[28].mxu1 }
 0x128   : > { %v2779_v9 = vpack.c.bf16 %v1424_v2, %v1408_v1  ;;  %v2795_v13 = vpack.c.bf16 %v1426_v3, %v1410_v54  ;;  %v878_v14 = vadd.f32 %v877_v8, %v3433_v60  ;;  %v766_v15 = vpop.f32.mrb[29].mxu0  ;;  %v879_v16 = vpop.f32.mrb[29].mxu1  ;;  %v765_v20 = vadd.f32 %v764_v7, %v3433_v60 }
 0x129   : > { %v2777_v17 = vpack.c.bf16 %v1425_v5, %v1409_v4  ;;  %v2793_v18 = vpack.c.bf16 %v1427_v6, %v1411_v61  ;;  %v880_v19 = vadd.f32 %v879_v16, %v3433_v60  ;;  %v767_v21 = vadd.f32 %v766_v15, %v3433_v60 }
 0x12a   : > { %v1442_v24 = vmax.f32 %v878_v14, 0.0  ;;  %v1440_v34 = vmax.f32 %v765_v20, 0.0 }
 0x12b   : > { %v770_v22 = vpop.f32.mrb[30].mxu0  ;;  %v883_v23 = vpop.f32.mrb[30].mxu1  ;;  %2778 = vmatprep.subr.bf16.mxu0 %v2777_v17  ;;  %2794 = vmatprep.subr.bf16.mxu1 %v2793_v18  ;;  %v1443_v31 = vmax.f32 %v880_v19, 0.0  ;;  %v1441_v38 = vmax.f32 %v767_v21, 0.0 }
 0x12c   : > { %v771_v26 = vadd.f32 %v770_v22, %v3437_v12  ;;  %v884_v28 = vadd.f32 %v883_v23, %v3437_v12  ;;  %v772_v29 = vpop.f32.mrb[31].mxu0  ;;  %v885_v30 = vpop.f32.mrb[31].mxu1  ;;  %2780 = vmatpush1.bf16.msra.mxu0 %v2779_v9  ;;  %2796 = vmatpush1.bf16.msra.mxu1 %v2795_v13 }
 0x12d   : > { %v773_v32 = vadd.f32 %v772_v29, %v3437_v12  ;;  %v886_v33 = vadd.f32 %v885_v30, %v3437_v12 }
 0x12e   : > { %v1456_v35 = vmax.f32 %v771_v26, 0.0  ;;  %v1458_v36 = vmax.f32 %v884_v28, 0.0 }
 0x12f   : > { %v1457_v39 = vmax.f32 %v773_v32, 0.0  ;;  %v1459_v40 = vmax.f32 %v886_v33, 0.0  ;;  %v954_v42 = vpop.f32.mrb[32].mxu0  ;;  %v1067_v44 = vpop.f32.mrb[32].mxu1 }
 0x130   : > { %v2783_v45 = vpack.c.bf16 %v1456_v35, %v1440_v34  ;;  %v2799_v47 = vpack.c.bf16 %v1458_v36, %v1442_v24  ;;  %v956_v48 = vpop.f32.mrb[33].mxu0  ;;  %v1069_v49 = vpop.f32.mrb[33].mxu1  ;;  %v955_v52 = vadd.f32 %v954_v42, %v3397_v37  ;;  %v1068_v53 = vadd.f32 %v1067_v44, %v3397_v37 }
 0x131   : > { %v2781_v50 = vpack.c.bf16 %v1457_v39, %v1441_v38  ;;  %v2797_v51 = vpack.c.bf16 %v1459_v40, %v1443_v31  ;;  %v957_v54 = vadd.f32 %v956_v48, %v3397_v37  ;;  %v1070_v56 = vadd.f32 %v1069_v49, %v3397_v37 }
 0x132   : > { %v1348_v3 = vmax.f32 %v955_v52, 0.0  ;;  %v1350_v4 = vmax.f32 %v1068_v53, 0.0 }
 0x133   : > { %v960_v57 = vpop.f32.mrb[34].mxu0  ;;  %v1073_v58 = vpop.f32.mrb[34].mxu1  ;;  %2782 = vmatprep.subr.bf16.mxu0 %v2781_v50  ;;  %2798 = vmatprep.subr.bf16.mxu1 %v2797_v51  ;;  %v1349_v7 = vmax.f32 %v957_v54, 0.0  ;;  %v1351_v8 = vmax.f32 %v1070_v56, 0.0 }
 0x134   : > { %v961_v59 = vadd.f32 %v960_v57, %v3400_v43  ;;  %v1074_v61 = vadd.f32 %v1073_v58, %v3400_v43  ;;  %v962_v62 = vpop.f32.mrb[35].mxu0  ;;  %v1075_v63 = vpop.f32.mrb[35].mxu1  ;;  %2784 = vmatpush1.bf16.msra.mxu0 %v2783_v45  ;;  %2800 = vmatpush1.bf16.msra.mxu1 %v2799_v47 }
 0x135   : > { %v963_v1 = vadd.f32 %v962_v62, %v3400_v43  ;;  %v1076_v2 = vadd.f32 %v1075_v63, %v3400_v43 }
 0x136   : > { %v1364_v5 = vmax.f32 %v961_v59, 0.0  ;;  %v1366_v6 = vmax.f32 %v1074_v61, 0.0 }
 0x137   : > { %v1365_v9 = vmax.f32 %v963_v1, 0.0  ;;  %v1367_v13 = vmax.f32 %v1076_v2, 0.0  ;;  %v966_v14 = vpop.f32.mrb[36].mxu0  ;;  %v1079_v15 = vpop.f32.mrb[36].mxu1  ;;  %2710 = vmatmul.mubr.msk.f32.vlgmr.msra.gmra.mrb[70].mxu0 %vm1489_vm2, %v3454_v55  ;;  %2713 = vmatmul.mubr.msk.f32.vlgmr.msra.gmra.mrb[70].mxu1 %vm1489_vm2, %v3454_v55 }
 0x138   : > { %v2803_v16 = vpack.c.bf16 %v1364_v5, %v1348_v3  ;;  %v2819_v17 = vpack.c.bf16 %v1366_v6, %v1350_v4  ;;  %v968_v18 = vpop.f32.mrb[37].mxu0  ;;  %v1081_v19 = vpop.f32.mrb[37].mxu1  ;;  %1735 = vmatprep.mubr.f32.mxu0 %v3010_v0  ;;  %1818 = vmatprep.mubr.f32.mxu1 %v3010_v0  ;;  %v967_v22 = vadd.f32 %v966_v14, %v3404_v46 }
 0x139   : > { %v2801_v20 = vpack.c.bf16 %v1365_v9, %v1349_v7  ;;  %v2817_v21 = vpack.c.bf16 %v1367_v13, %v1351_v8  ;;  %v1080_v23 = vadd.f32 %v1079_v15, %v3404_v46  ;;  %v969_v24 = vadd.f32 %v968_v18, %v3404_v46 }
 0x13a   : > { %v1082_v26 = vadd.f32 %v1081_v19, %v3404_v46  ;;  %v1380_v36 = vmax.f32 %v967_v22, 0.0 }
 0x13b   : > { %v972_v28 = vpop.f32.mrb[38].mxu0  ;;  %v1085_v29 = vpop.f32.mrb[38].mxu1  ;;  %2711 = vmatmul.mubr.msk.f32.gmra.mrb[72].mxu0 %vm1489_vm2, %v3467_v11  ;;  %2714 = vmatmul.mubr.msk.f32.gmra.mrb[72].mxu1 %vm1489_vm2, %v3467_v11  ;;  %v1382_v38 = vmax.f32 %v1080_v23, 0.0  ;;  %v1381_v42 = vmax.f32 %v969_v24, 0.0 }
 0x13c   : > { %v973_v30 = vadd.f32 %v972_v28, %v3412_v10  ;;  %v1086_v31 = vadd.f32 %v1085_v29, %v3412_v10  ;;  %2802 = vmatprep.subr.bf16.mxu0 %v2801_v20  ;;  %2818 = vmatprep.subr.bf16.mxu1 %v2817_v21  ;;  %v974_v32 = vpop.f32.mrb[39].mxu0  ;;  %v1087_v33 = vpop.f32.mrb[39].mxu1  ;;  %v1383_v44 = vmax.f32 %v1082_v26, 0.0 }
 0x13d   : > { %v975_v34 = vadd.f32 %v974_v32, %v3412_v10  ;;  %v1088_v35 = vadd.f32 %v1087_v33, %v3412_v10  ;;  %2804 = vmatpush1.bf16.msra.mxu0 %v2803_v16  ;;  %2820 = vmatpush1.bf16.msra.mxu1 %v2819_v17 }
 0x13e   : > { %v1396_v39 = vmax.f32 %v973_v30, 0.0  ;;  %v1398_v40 = vmax.f32 %v1086_v31, 0.0  ;;  %1741 = vmatprep.mubr.f32.mxu0 %v3010_v0  ;;  %1824 = vmatprep.mubr.f32.mxu1 %v3010_v0 }
 0x13f   : > { %v1397_v45 = vmax.f32 %v975_v34, 0.0  ;;  %v1399_v47 = vmax.f32 %v1088_v35, 0.0  ;;  %v978_v48 = vpop.f32.mrb[40].mxu0  ;;  %v1091_v49 = vpop.f32.mrb[40].mxu1  ;;  %2712 = vmatmul.mubr.msk.f32.gmra.mrb[74].mxu0 %vm1489_vm2, %v3482_v25  ;;  %2715 = vmatmul.mubr.msk.f32.gmra.mrb[74].mxu1 %vm1489_vm2, %v3482_v25 }
 0x140   : > { %v2807_v50 = vpack.c.bf16 %v1396_v39, %v1380_v36  ;;  %v2823_v51 = vpack.c.bf16 %v1398_v40, %v1382_v38  ;;  %v980_v52 = vpop.f32.mrb[41].mxu0  ;;  %v1093_v53 = vpop.f32.mrb[41].mxu1  ;;  %1895 = vmatprep.mubr.f32.mxu0 %v3010_v0  ;;  %1978 = vmatprep.mubr.f32.mxu1 %v3010_v0  ;;  %v979_v57 = vadd.f32 %v978_v48, %v3421_v27 }
 0x141   : > { %v2805_v54 = vpack.c.bf16 %v1397_v45, %v1381_v42  ;;  %v2821_v56 = vpack.c.bf16 %v1399_v47, %v1383_v44  ;;  %v1092_v58 = vadd.f32 %v1091_v49, %v3421_v27  ;;  %v981_v59 = vadd.f32 %v980_v52, %v3421_v27 }
 0x142   : > { %v1094_v61 = vadd.f32 %v1093_v53, %v3421_v27  ;;  %v1412_v7 = vmax.f32 %v979_v57, 0.0 }
 0x143   : > { %v984_v62 = vpop.f32.mrb[42].mxu0  ;;  %v1097_v63 = vpop.f32.mrb[42].mxu1  ;;  %2806 = vmatprep.subr.bf16.mxu0 %v2805_v54  ;;  %2822 = vmatprep.subr.bf16.mxu1 %v2821_v56  ;;  %v1414_v8 = vmax.f32 %v1092_v58, 0.0  ;;  %v1413_v14 = vmax.f32 %v981_v59, 0.0 }
 0x144   : > { %v985_v1 = vadd.f32 %v984_v62, %v3424_v41  ;;  %v1098_v2 = vadd.f32 %v1097_v63, %v3424_v41  ;;  %v986_v3 = vpop.f32.mrb[43].mxu0  ;;  %v1099_v4 = vpop.f32.mrb[43].mxu1  ;;  %2808 = vmatpush1.bf16.msra.mxu0 %v2807_v50  ;;  %2824 = vmatpush1.bf16.msra.mxu1 %v2823_v51  ;;  %v1415_v15 = vmax.f32 %v1094_v61, 0.0 }
 0x145   : > { %v987_v5 = vadd.f32 %v986_v3, %v3424_v41  ;;  %v1100_v6 = vadd.f32 %v1099_v4, %v3424_v41 }
 0x146   : > { %v1428_v9 = vmax.f32 %v985_v1, 0.0  ;;  %v1430_v13 = vmax.f32 %v1098_v2, 0.0 }
 0x147   : > { %v1429_v16 = vmax.f32 %v987_v5, 0.0  ;;  %v1431_v17 = vmax.f32 %v1100_v6, 0.0  ;;  %v990_v18 = vpop.f32.mrb[44].mxu0  ;;  %v1103_v19 = vpop.f32.mrb[44].mxu1 }
 0x148   : > { %v2811_v20 = vpack.c.bf16 %v1428_v9, %v1412_v7  ;;  %v2827_v21 = vpack.c.bf16 %v1430_v13, %v1414_v8  ;;  %v992_v22 = vpop.f32.mrb[45].mxu0  ;;  %v1105_v23 = vpop.f32.mrb[45].mxu1  ;;  %v991_v28 = vadd.f32 %v990_v18, %v3433_v60  ;;  %v1104_v29 = vadd.f32 %v1103_v19, %v3433_v60 }
 0x149   : > { %v2809_v24 = vpack.c.bf16 %v1429_v16, %v1413_v14  ;;  %v2825_v26 = vpack.c.bf16 %v1431_v17, %v1415_v15  ;;  %v993_v30 = vadd.f32 %v992_v22, %v3433_v60  ;;  %v1106_v31 = vadd.f32 %v1105_v23, %v3433_v60 }
 0x14a   : > { %v1444_v42 = vmax.f32 %v991_v28, 0.0  ;;  %v1446_v44 = vmax.f32 %v1104_v29, 0.0 }
 0x14b   : > { %v996_v32 = vpop.f32.mrb[46].mxu0  ;;  %v1109_v33 = vpop.f32.mrb[46].mxu1  ;;  %2810 = vmatprep.subr.bf16.mxu0 %v2809_v24  ;;  %2826 = vmatprep.subr.bf16.mxu1 %v2825_v26  ;;  %v1445_v48 = vmax.f32 %v993_v30, 0.0  ;;  %v1447_v49 = vmax.f32 %v1106_v31, 0.0 }
 0x14c   : > { %v997_v34 = vadd.f32 %v996_v32, %v3437_v12  ;;  %v1110_v35 = vadd.f32 %v1109_v33, %v3437_v12  ;;  %v998_v36 = vpop.f32.mrb[47].mxu0  ;;  %v1111_v38 = vpop.f32.mrb[47].mxu1  ;;  %2812 = vmatpush1.bf16.msra.mxu0 %v2811_v20  ;;  %2828 = vmatpush1.bf16.msra.mxu1 %v2827_v21 }
 0x14d   : > { %v999_v39 = vadd.f32 %v998_v36, %v3437_v12  ;;  %v1112_v40 = vadd.f32 %v1111_v38, %v3437_v12 }
 0x14e   : > { %v1460_v45 = vmax.f32 %v997_v34, 0.0  ;;  %v1462_v47 = vmax.f32 %v1110_v35, 0.0 }
 0x14f   : > { %v1461_v50 = vmax.f32 %v999_v39, 0.0  ;;  %v1463_v51 = vmax.f32 %v1112_v40, 0.0  ;;  %v1180_v52 = vpop.f32.mrb[48].mxu0  ;;  %v1293_v53 = vpop.f32.mrb[48].mxu1 }
 0x150   : > { %v2815_v54 = vpack.c.bf16 %v1460_v45, %v1444_v42  ;;  %v2831_v56 = vpack.c.bf16 %v1462_v47, %v1446_v44  ;;  %v1182_v57 = vpop.f32.mrb[49].mxu0  ;;  %v1295_v58 = vpop.f32.mrb[49].mxu1  ;;  %v1181_v62 = vadd.f32 %v1180_v52, %v3397_v37  ;;  %v1294_v63 = vadd.f32 %v1293_v53, %v3397_v37 }
 0x151   : > { %v2813_v59 = vpack.c.bf16 %v1461_v50, %v1445_v48  ;;  %v2829_v61 = vpack.c.bf16 %v1463_v51, %v1447_v49  ;;  %v1183_v1 = vadd.f32 %v1182_v57, %v3397_v37  ;;  %v1296_v2 = vadd.f32 %v1295_v58, %v3397_v37 }
 0x152   : > { %v1352_v14 = vmax.f32 %v1181_v62, 0.0  ;;  %v1354_v15 = vmax.f32 %v1294_v63, 0.0 }
 0x153   : > { %v1186_v3 = vpop.f32.mrb[50].mxu0  ;;  %v1299_v4 = vpop.f32.mrb[50].mxu1  ;;  %2814 = vmatprep.subr.bf16.mxu0 %v2813_v59  ;;  %2830 = vmatprep.subr.bf16.mxu1 %v2829_v61  ;;  %v1353_v17 = vmax.f32 %v1183_v1, 0.0  ;;  %v1355_v18 = vmax.f32 %v1296_v2, 0.0 }
 0x154   : > { %v1187_v5 = vadd.f32 %v1186_v3, %v3400_v43  ;;  %v1300_v6 = vadd.f32 %v1299_v4, %v3400_v43  ;;  %v1188_v7 = vpop.f32.mrb[51].mxu0  ;;  %v1301_v8 = vpop.f32.mrb[51].mxu1  ;;  %2816 = vmatpush1.bf16.msra.mxu0 %v2815_v54  ;;  %2832 = vmatpush1.bf16.msra.mxu1 %v2831_v56 }
 0x155   : > { %v1189_v9 = vadd.f32 %v1188_v7, %v3400_v43  ;;  %v1302_v13 = vadd.f32 %v1301_v8, %v3400_v43 }
 0x156   : > { %v1368_v16 = vmax.f32 %v1187_v5, 0.0  ;;  %v1370_v37 = vmax.f32 %v1300_v6, 0.0 }
 0x157   : > { %v1369_v19 = vmax.f32 %v1189_v9, 0.0  ;;  %v1371_v20 = vmax.f32 %v1302_v13, 0.0  ;;  %v1192_v21 = vpop.f32.mrb[52].mxu0  ;;  %v1305_v22 = vpop.f32.mrb[52].mxu1  ;;  %2716 = vmatmul.mubr.msk.f32.vlgmr.msra.gmra.mrb[76].mxu0 %vm1489_vm2, %v3454_v55  ;;  %2719 = vmatmul.mubr.msk.f32.vlgmr.msra.gmra.mrb[76].mxu1 %vm1489_vm2, %v3454_v55 }
 0x158   : > { %v2835_v23 = vpack.c.bf16 %v1368_v16, %v1352_v14  ;;  %v2851_v24 = vpack.c.bf16 %v1370_v37, %v1354_v15  ;;  %v1194_v26 = vpop.f32.mrb[53].mxu0  ;;  %v1307_v43 = vpop.f32.mrb[53].mxu1  ;;  %1901 = vmatprep.mubr.f32.mxu0 %v3010_v0  ;;  %1984 = vmatprep.mubr.f32.mxu1 %v3010_v0  ;;  %v1193_v30 = vadd.f32 %v1192_v21, %v3404_v46 }
 0x159   : > { %v2833_v28 = vpack.c.bf16 %v1369_v19, %v1353_v17  ;;  %v2849_v29 = vpack.c.bf16 %v1371_v20, %v1355_v18  ;;  %v1306_v31 = vadd.f32 %v1305_v22, %v3404_v46  ;;  %v1195_v32 = vadd.f32 %v1194_v26, %v3404_v46 }
 0x15a   : > { %v1308_v33 = vadd.f32 %v1307_v43, %v3404_v46  ;;  %v1384_v44 = vmax.f32 %v1193_v30, 0.0 }
 0x15b   : > { %v1198_v34 = vpop.f32.mrb[54].mxu0  ;;  %v1311_v35 = vpop.f32.mrb[54].mxu1  ;;  %2717 = vmatmul.mubr.msk.f32.gmra.mrb[78].mxu0 %vm1489_vm2, %v3467_v11  ;;  %2720 = vmatmul.mubr.msk.f32.gmra.mrb[78].mxu1 %vm1489_vm2, %v3467_v11  ;;  %v1386_v45 = vmax.f32 %v1306_v31, 0.0  ;;  %v1385_v49 = vmax.f32 %v1195_v32, 0.0 }
 0x15c   : > { %v1199_v36 = vadd.f32 %v1198_v34, %v3412_v10  ;;  %v1312_v38 = vadd.f32 %v1311_v35, %v3412_v10  ;;  %2834 = vmatprep.subr.bf16.mxu0 %v2833_v28  ;;  %2850 = vmatprep.subr.bf16.mxu1 %v2849_v29  ;;  %v1200_v39 = vpop.f32.mrb[55].mxu0  ;;  %v1313_v40 = vpop.f32.mrb[55].mxu1  ;;  %v1387_v50 = vmax.f32 %v1308_v33, 0.0 }
 0x15d   : > { %v1201_v42 = vadd.f32 %v1200_v39, %v3412_v10  ;;  %v1314_v46 = vadd.f32 %v1313_v40, %v3412_v10  ;;  %2836 = vmatpush1.bf16.msra.mxu0 %v2835_v23  ;;  %2852 = vmatpush1.bf16.msra.mxu1 %v2851_v24 }
 0x15e   : > { %v1400_v47 = vmax.f32 %v1199_v36, 0.0  ;;  %v1402_v48 = vmax.f32 %v1312_v38, 0.0  ;;  %1907 = vmatprep.mubr.f32.mxu0 %v3010_v0  ;;  %1990 = vmatprep.mubr.f32.mxu1 %v3010_v0 }
 0x15f   : > { %v1401_v51 = vmax.f32 %v1201_v42, 0.0  ;;  %v1403_v52 = vmax.f32 %v1314_v46, 0.0  ;;  %v1204_v53 = vpop.f32.mrb[56].mxu0  ;;  %v1317_v54 = vpop.f32.mrb[56].mxu1  ;;  %2718 = vmatmul.mubr.msk.f32.gmra.mrb[80].mxu0 %vm1489_vm2, %v3482_v25  ;;  %2721 = vmatmul.mubr.msk.f32.gmra.mrb[80].mxu1 %vm1489_vm2, %v3482_v25 }
 0x160   : > { %v2839_v10 = vpack.c.bf16 %v1400_v47, %v1384_v44  ;;  %v2855_v56 = vpack.c.bf16 %v1402_v48, %v1386_v45  ;;  %v1206_v57 = vpop.f32.mrb[57].mxu0  ;;  %v1319_v58 = vpop.f32.mrb[57].mxu1  ;;  %2061 = vmatprep.mubr.f32.mxu0 %v3010_v0  ;;  %2144 = vmatprep.mubr.f32.mxu1 %v3010_v0  ;;  %v1205_v62 = vadd.f32 %v1204_v53, %v3421_v27 }
 0x161   : > { %v2837_v59 = vpack.c.bf16 %v1401_v51, %v1385_v49  ;;  %v2853_v61 = vpack.c.bf16 %v1403_v52, %v1387_v50  ;;  %v1318_v63 = vadd.f32 %v1317_v54, %v3421_v27  ;;  %v1207_v1 = vadd.f32 %v1206_v57, %v3421_v27 }
 0x162   : > { %v1320_v2 = vadd.f32 %v1319_v58, %v3421_v27  ;;  %v1416_v14 = vmax.f32 %v1205_v62, 0.0 }
 0x163   : > { %v1210_v3 = vpop.f32.mrb[58].mxu0  ;;  %v1323_v4 = vpop.f32.mrb[58].mxu1  ;;  %2838 = vmatprep.subr.bf16.mxu0 %v2837_v59  ;;  %2854 = vmatprep.subr.bf16.mxu1 %v2853_v61  ;;  %v1418_v15 = vmax.f32 %v1318_v63, 0.0  ;;  %v1417_v37 = vmax.f32 %v1207_v1, 0.0 }
 0x164   : > { %v1211_v5 = vadd.f32 %v1210_v3, %v3424_v41  ;;  %v1324_v6 = vadd.f32 %v1323_v4, %v3424_v41  ;;  %v1212_v7 = vpop.f32.mrb[59].mxu0  ;;  %v1325_v8 = vpop.f32.mrb[59].mxu1  ;;  %2840 = vmatpush1.bf16.msra.mxu0 %v2839_v10  ;;  %2856 = vmatpush1.bf16.msra.mxu1 %v2855_v56  ;;  %v1419_v17 = vmax.f32 %v1320_v2, 0.0 }
 0x165   : > { %v1213_v9 = vadd.f32 %v1212_v7, %v3424_v41  ;;  %v1326_v13 = vadd.f32 %v1325_v8, %v3424_v41 }
 0x166   : > { %v1432_v16 = vmax.f32 %v1211_v5, 0.0  ;;  %v1434_v27 = vmax.f32 %v1324_v6, 0.0 }
 0x167   : > { %v1433_v18 = vmax.f32 %v1213_v9, 0.0  ;;  %v1435_v19 = vmax.f32 %v1326_v13, 0.0  ;;  %v1216_v20 = vpop.f32.mrb[60].mxu0  ;;  %v1329_v21 = vpop.f32.mrb[60].mxu1 }
 0x168   : > { %v2843_v22 = vpack.c.bf16 %v1432_v16, %v1416_v14  ;;  %v2859_v23 = vpack.c.bf16 %v1434_v27, %v1418_v15  ;;  %v1218_v24 = vpop.f32.mrb[61].mxu0  ;;  %v1331_v26 = vpop.f32.mrb[61].mxu1  ;;  %v1217_v29 = vadd.f32 %v1216_v20, %v3433_v60  ;;  %v1330_v41 = vadd.f32 %v1329_v21, %v3433_v60 }
 0x169   : > { %v2841_v43 = vpack.c.bf16 %v1433_v18, %v1417_v37  ;;  %v2857_v28 = vpack.c.bf16 %v1435_v19, %v1419_v17  ;;  %v1219_v30 = vadd.f32 %v1218_v24, %v3433_v60  ;;  %v1332_v31 = vadd.f32 %v1331_v26, %v3433_v60  ;;  %v3640_v21 = vpop.permute.xlu0 %1486 }
 0x16a   : > { %v1448_v42 = vmax.f32 %v1217_v29, 0.0  ;;  %v1450_v46 = vmax.f32 %v1330_v41, 0.0 }
 0x16b   : > { %v1222_v32 = vpop.f32.mrb[62].mxu0  ;;  %v1335_v33 = vpop.f32.mrb[62].mxu1  ;;  %2842 = vmatprep.subr.bf16.mxu0 %v2841_v43  ;;  %2858 = vmatprep.subr.bf16.mxu1 %v2857_v28  ;;  %v1449_v45 = vmax.f32 %v1219_v30, 0.0  ;;  %v1451_v47 = vmax.f32 %v1332_v31, 0.0 }
 0x16c   : > { %v1223_v34 = vadd.f32 %v1222_v32, %v3437_v12  ;;  %v1336_v35 = vadd.f32 %v1335_v33, %v3437_v12  ;;  %v1224_v36 = vpop.f32.mrb[63].mxu0  ;;  %v1337_v38 = vpop.f32.mrb[63].mxu1  ;;  %2844 = vmatpush1.bf16.msra.mxu0 %v2843_v22  ;;  %2860 = vmatpush1.bf16.msra.mxu1 %v2859_v23 }
 0x16d   : > { %v1225_v39 = vadd.f32 %v1224_v36, %v3437_v12  ;;  %v1338_v40 = vadd.f32 %v1337_v38, %v3437_v12  ;;  %v2163_v12 = vld [vmem:[%s284_s28] sm:$0x77] }
 0x16e   : > { %v1464_v44 = vmax.f32 %v1223_v34, 0.0  ;;  %v1466_v60 = vmax.f32 %v1336_v35, 0.0 }
 0x16f   : > { %v1465_v48 = vmax.f32 %v1225_v39, 0.0  ;;  %v1467_v49 = vmax.f32 %v1338_v40, 0.0 }
 0x170   : > { %v2847_v50 = vpack.c.bf16 %v1464_v44, %v1448_v42  ;;  %v2863_v51 = vpack.c.bf16 %v1466_v60, %v1450_v46 }
 0x171   : > { %v2845_v52 = vpack.c.bf16 %v1465_v48, %v1449_v45  ;;  %v2861_v53 = vpack.c.bf16 %v1467_v49, %v1451_v47 }
 0x173   : > { %2846 = vmatprep.subr.bf16.mxu0 %v2845_v52  ;;  %2862 = vmatprep.subr.bf16.mxu1 %v2861_v53  ;;  %v2211_v52 = vlaneseq }
 0x174   : > { %2848 = vmatpush1.bf16.msra.mxu0 %v2847_v50  ;;  %2864 = vmatpush1.bf16.msra.mxu1 %v2863_v51 }
 0x175   : > { %v2212_v53 = vshrl.u32 %v2211_v52, 7 }
 0x177   : > { %2722 = vmatmul.mubr.msk.f32.vlgmr.msra.gmra.mrb[82].mxu0 %vm1489_vm2, %v3454_v55  ;;  %2725 = vmatmul.mubr.msk.f32.vlgmr.msra.gmra.mrb[82].mxu1 %vm1489_vm2, %v3454_v55  ;;  %v2164_v55 = vmul.f32 %v2163_v12, %v2163_v12  ;;  %v3660_v12 = vsub.s32 0, %v2212_v53 }
 0x178   : > { %2067 = vmatprep.mubr.f32.mxu0 %v3010_v0  ;;  %2150 = vmatprep.mubr.f32.mxu1 %v3010_v0 }
 0x179   : > { %v2166_v54 = vcombine.high %v2164_v55, %v2164_v55 }
 0x17b   : > { %2723 = vmatmul.mubr.msk.f32.gmra.mrb[84].mxu0 %vm1489_vm2, %v3467_v11  ;;  %2726 = vmatmul.mubr.msk.f32.gmra.mrb[84].mxu1 %vm1489_vm2, %v3467_v11  ;;  %v2169_v11 = vsel %vm2168_vm3, %v2164_v55, 0.0  ;;  %v2176_v10 = vsel %vm2168_vm3, %v2166_v54, 0.0 }
 0x17c   : > { %2073 = vmatprep.mubr.f32.mxu0 %v3010_v0  ;;  %2156 = vmatprep.mubr.f32.mxu1 %v3010_v0  ;;  %v2170_v56 = vrot.slane %v2169_v11, 4  ;;  %v2177_v57 = vrot.slane %v2176_v10, 4 }
 0x17e   : > { %v2171_v0 = vadd.f32 %v2170_v56, %v2169_v11  ;;  %v2178_v58 = vadd.f32 %v2177_v57, %v2176_v10  ;;  %v3662_v11 = vpop.permute.xlu1 %1476  ;;  %v3664_v57 = vpop.permute.xlu0 %1481 }
 0x17f   : > { %2724 = vmatmul.mubr.msk.f32.gmra.mrb[86].mxu0 %vm1489_vm2, %v3482_v25  ;;  %2727 = vmatmul.mubr.msk.f32.gmra.mrb[86].mxu1 %vm1489_vm2, %v3482_v25 }
 0x180   : > { %v2172_v59 = vrot.slane %v2171_v0, 2  ;;  %v2179_v61 = vrot.slane %v2178_v58, 2 }
 0x182   : > { %v2173_v62 = vadd.f32 %v2172_v59, %v2171_v0  ;;  %v2180_v63 = vadd.f32 %v2179_v61, %v2178_v58 }
 0x184   : > { %v2174_v25 = vrot.slane %v2173_v62, 1  ;;  %v2181_v1 = vrot.slane %v2180_v63, 1 }
 0x186   : > { %v2175_v2 = vadd.f32 %v2174_v25, %v2173_v62  ;;  %v2182_v3 = vadd.f32 %v2181_v1, %v2180_v63 }
 0x188   : > { %2910 = vrsqrt.f32 %v2175_v2  ;;  %vm2185_vm4 = vcmp.eq.f32.partialorder %v2175_v2, inf  ;;  %vm2192_vm5 = vcmp.eq.f32.partialorder %v2182_v3, inf  ;;  %v2188_v27 = vand.u32 2147483648, %v2175_v2 }
 0x189   : > { %2912 = vrsqrt.f32 %v2182_v3  ;;  %vm2187_vm6 = vcmp.eq.f32.partialorder %v2175_v2, 0.0  ;;  %v2195_v19 = vand.u32 2147483648, %v2182_v3  ;;  %vm2194_vm7 = vcmp.eq.f32.partialorder %v2182_v3, 0.0 }
 0x192   : > { %v2911_v4 = vpop.eup %2910 }
 0x193   : > { %v2913_v5 = vpop.eup %2912  ;;  %v2184_v13 = vmul.f32 %v2911_v4, %v2175_v2 }
 0x194   : > { %v2191_v14 = vmul.f32 %v2913_v5, %v2182_v3 }
 0x195   : > { %v2186_v18 = vsel %vm2185_vm4, %v2175_v2, %v2184_v13 }
 0x196   : > { %v2193_v20 = vsel %vm2192_vm5, %v2182_v3, %v2191_v14  ;;  %v3642_v23 = vsel %vm2187_vm6, %v2188_v27, %v2186_v18 }
 0x197   : > { %v3646_v29 = vsel %vm2194_vm7, %v2195_v19, %v2193_v20  ;;  %v3651_v32 = vmul.f32 0.5714286, %v3642_v23 }
 0x198   : > { %v3654_v35 = vmul.f32 0.5714286, %v3646_v29 }
 0x1ea   : > { %v1565_v6 = vpop.f32.mrb[64].mxu0  ;;  %v3630_v7 = vpop.f32.mrb[64].mxu1 }
 0x1eb   : > { %v3632_v8 = vpop.f32.mrb[65].mxu0  ;;  %v3634_v9 = vpop.f32.mrb[65].mxu1  ;;  %v1566_v0 = vadd.f32 %v1565_v6, %v3662_v11 }
 0x1ec   : > { %v1568_v3 = vadd.f32 %v3632_v8, %v3662_v11 }
 0x1ee   : > { %v1571_v15 = vpop.f32.mrb[66].mxu0  ;;  %v3636_v16 = vpop.f32.mrb[66].mxu1 }
 0x1ef   : > { %v1573_v37 = vpop.f32.mrb[67].mxu0  ;;  %v3638_v17 = vpop.f32.mrb[67].mxu1  ;;  %v1572_v61 = vadd.f32 %v1571_v15, %v3664_v57 }
 0x1f0   : > { %v1574_v4 = vadd.f32 %v1573_v37, %v3664_v57 }
 0x1f2   : > { %v1577_v22 = vpop.f32.mrb[68].mxu0  ;;  %v1660_v24 = vpop.f32.mrb[68].mxu1 }
 0x1f3   : > { %v1578_v26 = vadd.f32 %v1577_v22, %v3640_v21  ;;  %v1661_v43 = vadd.f32 %v1660_v24, %v3640_v21  ;;  %v1579_v28 = vpop.f32.mrb[69].mxu0  ;;  %v1662_v41 = vpop.f32.mrb[69].mxu1 }
 0x1f4   : > { %v1580_v30 = vadd.f32 %v1579_v28, %v3640_v21  ;;  %v1663_v31 = vadd.f32 %v1662_v41, %v3640_v21 }
 0x1f5   : > { %v2199_v33 = vmax.f32 %v1578_v26, 0.0  ;;  %v2233_v34 = vmax.f32 %v1661_v43, 0.0 }
 0x1f6   : > { %v2200_v36 = vmax.f32 %v1580_v30, 0.0  ;;  %v2234_v38 = vmax.f32 %v1663_v31, 0.0 }
 0x1f7   : > { %v2201_v39 = vsub.f32 0.0, %v2199_v33  ;;  %v2235_v40 = vsub.f32 0.0, %v2233_v34  ;;  %v1649_v34 = vadd.f32 %v3630_v7, %v3662_v11 }
 0x1f8   : > { %v2202_v42 = vsub.f32 0.0, %v2200_v36  ;;  %v2236_v46 = vsub.f32 0.0, %v2234_v38  ;;  %v1655_v36 = vadd.f32 %v3636_v16, %v3664_v57 }
 0x1f9   : > { %v2203_v44 = vmul.f32 %v2201_v39, %v3651_v32  ;;  %v2237_v60 = vmul.f32 %v2235_v40, %v3651_v32 }
 0x1fa   : > { %v2204_v45 = vmul.f32 %v2202_v42, %v3654_v35  ;;  %v2238_v47 = vmul.f32 %v2236_v46, %v3654_v35 }
 0x1fb   : > { %v2205_v48 = vmul.f32 1.442695, %v2203_v44  ;;  %v2239_v49 = vmul.f32 1.442695, %v2237_v60  ;;  %v1651_v44 = vadd.f32 %v3634_v9, %v3662_v11  ;;  %v1657_v60 = vadd.f32 %v3638_v17, %v3664_v57 }
 0x1fc   : > { %v2207_v50 = vmul.f32 1.442695, %v2204_v45  ;;  %v2241_v51 = vmul.f32 1.442695, %v2238_v47 }
 0x1fd   : > { %2914 = vpow2.f32 %v2205_v48 }
 0x1fe   : > { %2916 = vpow2.f32 %v2239_v49 }
 0x1ff   : > { %2918 = vpow2.f32 %v2207_v50 }
 0x200   : > { %2920 = vpow2.f32 %v2241_v51 }
 0x207   : > { %v2915_v55 = vpop.eup %2914 }
 0x208   : > { %v2917_v54 = vpop.eup %2916  ;;  %v2209_v10 = vsub.f32 1.0, %v2915_v55 }
 0x209   : > { %v2919_v56 = vpop.eup %2918  ;;  %v2243_v58 = vsub.f32 1.0, %v2917_v54 }
 0x20a   : > { %v2921_v59 = vpop.eup %2920  ;;  %v2214_v62 = vrot.slane %v2209_v10, %v3660_v12  ;;  %v2229_v63 = vsub.f32 1.0, %v2209_v10  ;;  %v2210_v25 = vsub.f32 1.0, %v2919_v56  ;;  %v3669_v1 = vpop.f32.mrb[70].mxu0 }
 0x20b   : > { %v3671_v2 = vpop.f32.mrb[70].mxu1  ;;  %v2265_v5 = vsub.f32 1.0, %v2243_v58  ;;  %v2244_v13 = vsub.f32 1.0, %v2921_v59  ;;  %v3676_v6 = vpop.f32.mrb[71].mxu0 }
 0x20c   : > { %v3678_v14 = vpop.f32.mrb[71].mxu1  ;;  %v2219_v15 = vmul.f32 %v2214_v62, %v1566_v0  ;;  %v2221_v27 = vmul.f32 %v2214_v62, %v1572_v61  ;;  %v2231_v18 = vadd.f32 1e-10, %v2229_v63  ;;  %v2218_v19 = vrot.slane %v2210_v25, %v3660_v12 }
 0x20d   : > { %v2267_v20 = vadd.f32 1e-10, %v2265_v5  ;;  %v2230_v22 = vsub.f32 1.0, %v2210_v25  ;;  %v2266_v24 = vsub.f32 1.0, %v2244_v13 }
 0x20e   : > { %v2245_v26 = vmul.f32 %v2243_v58, %v2231_v18  ;;  %v2220_v43 = vmul.f32 %v2218_v19, %v1568_v3  ;;  %v2222_v28 = vmul.f32 %v2218_v19, %v1574_v4  ;;  %v3681_v8 = vpop.f32.mrb[72].mxu0  ;;  %v3683_v37 = vpop.f32.mrb[72].mxu1 }
 0x20f   : > { %v2232_v41 = vadd.f32 1e-10, %v2230_v22  ;;  %v2268_v30 = vadd.f32 1e-10, %v2266_v24  ;;  %v3685_v31 = vpop.f32.mrb[73].mxu0  ;;  %v3687_v33 = vpop.f32.mrb[73].mxu1  ;;  %v3694_v42 = vmul.f32 %v2267_v20, %v2231_v18 }
 0x210   : > { %v2250_v38 = vrot.slane %v2245_v26, %v3660_v12  ;;  %v2263_v39 = vadd.f32 %v2245_v26, %v2209_v10 }
 0x211   : > { %v2246_v40 = vmul.f32 %v2244_v13, %v2232_v41  ;;  %v3696_v46 = vmul.f32 %v2268_v30, %v2232_v41 }
 0x212   : > { %v2255_v45 = vmul.f32 %v2250_v38, %v1649_v34  ;;  %v2257_v47 = vmul.f32 %v2250_v38, %v1655_v36  ;;  %v1743_v7 = vpop.f32.mrb[74].mxu0  ;;  %v1826_v48 = vpop.f32.mrb[74].mxu1 }
 0x213   : > { %v2254_v16 = vrot.slane %v2246_v40, %v3660_v12  ;;  %v3703_v49 = vadd.f32 %v2246_v40, %v2210_v25  ;;  %v1744_v50 = vadd.f32 %v1743_v7, %v3640_v21  ;;  %v1827_v51 = vadd.f32 %v1826_v48, %v3640_v21  ;;  %v1745_v52 = vpop.f32.mrb[75].mxu0  ;;  %v1828_v53 = vpop.f32.mrb[75].mxu1 }
 0x214   : > { %v3707_v55 = vadd.f32 %v2255_v45, %v2219_v15  ;;  %v3709_v9 = vadd.f32 %v2257_v47, %v2221_v27  ;;  %v1746_v17 = vadd.f32 %v1745_v52, %v3640_v21  ;;  %v1829_v54 = vadd.f32 %v1828_v53, %v3640_v21 }
 0x215   : > { %v2256_v10 = vmul.f32 %v2254_v16, %v1651_v44  ;;  %v2258_v56 = vmul.f32 %v2254_v16, %v1657_v60  ;;  %v2271_v0 = vmax.f32 %v1744_v50, 0.0  ;;  %v2309_v58 = vmax.f32 %v1827_v51, 0.0 }
 0x216   : > { %v2272_v59 = vmax.f32 %v1746_v17, 0.0  ;;  %v2310_v61 = vmax.f32 %v1829_v54, 0.0  ;;  %v1732_v45 = vadd.f32 %v3669_v1, %v3662_v11  ;;  %v1815_v47 = vadd.f32 %v3671_v2, %v3662_v11 }
 0x217   : > { %v3713_v62 = vadd.f32 %v2256_v10, %v2220_v43  ;;  %v3715_v63 = vadd.f32 %v2258_v56, %v2222_v28  ;;  %v2273_v25 = vsub.f32 0.0, %v2271_v0  ;;  %v2311_v3 = vsub.f32 0.0, %v2309_v58 }
 0x218   : > { %v2274_v4 = vsub.f32 0.0, %v2272_v59  ;;  %v2312_v5 = vsub.f32 0.0, %v2310_v61  ;;  %v1738_v7 = vadd.f32 %v3681_v8, %v3664_v57  ;;  %v1734_v1 = vadd.f32 %v3676_v6, %v3662_v11 }
 0x219   : > { %v2275_v13 = vmul.f32 %v2273_v25, %v3651_v32  ;;  %v2313_v15 = vmul.f32 %v2311_v3, %v3651_v32  ;;  %v1817_v2 = vadd.f32 %v3678_v14, %v3662_v11  ;;  %v1740_v61 = vadd.f32 %v3685_v31, %v3664_v57 }
 0x21a   : > { %v2276_v27 = vmul.f32 %v2274_v4, %v3654_v35  ;;  %v2314_v18 = vmul.f32 %v2312_v5, %v3654_v35  ;;  %v1823_v31 = vadd.f32 %v3687_v33, %v3664_v57 }
 0x21b   : > { %v2277_v19 = vmul.f32 1.442695, %v2275_v13  ;;  %v2315_v20 = vmul.f32 1.442695, %v2313_v15 }
 0x21c   : > { %v2279_v22 = vmul.f32 1.442695, %v2276_v27  ;;  %v2317_v24 = vmul.f32 1.442695, %v2314_v18  ;;  %v1821_v27 = vadd.f32 %v3683_v37, %v3664_v57 }
 0x21d   : > { %2922 = vpow2.f32 %v2277_v19 }
 0x21e   : > { %2924 = vpow2.f32 %v2315_v20 }
 0x21f   : > { %2926 = vpow2.f32 %v2279_v22 }
 0x220   : > { %2928 = vpow2.f32 %v2317_v24 }
 0x227   : > { %v2923_v26 = vpop.eup %2922 }
 0x228   : > { %v2925_v43 = vpop.eup %2924  ;;  %v2281_v28 = vsub.f32 1.0, %v2923_v26 }
 0x229   : > { %v2927_v41 = vpop.eup %2926  ;;  %v2319_v30 = vsub.f32 1.0, %v2925_v43 }
 0x22a   : > { %v2929_v34 = vpop.eup %2928  ;;  %v2283_v36 = vmul.f32 %v2281_v28, %v3694_v42  ;;  %v2303_v38 = vsub.f32 1.0, %v2281_v28  ;;  %v2282_v40 = vsub.f32 1.0, %v2927_v41  ;;  %v3722_v44 = vpop.f32.mrb[76].mxu0 }
 0x22b   : > { %v3724_v60 = vpop.f32.mrb[76].mxu1  ;;  %v2320_v48 = vsub.f32 1.0, %v2929_v34  ;;  %v3732_v16 = vpop.f32.mrb[77].mxu0  ;;  %v2341_v54 = vsub.f32 1.0, %v2319_v30 }
 0x22c   : > { %v3734_v50 = vpop.f32.mrb[77].mxu1  ;;  %v2288_v51 = vrot.slane %v2283_v36, %v3660_v12  ;;  %v2301_v52 = vadd.f32 %v2283_v36, %v2263_v39  ;;  %v2305_v53 = vadd.f32 1e-10, %v2303_v38  ;;  %v2284_v17 = vmul.f32 %v2282_v40, %v3696_v46 }
 0x22d   : > { %v2304_v10 = vsub.f32 1.0, %v2282_v40  ;;  %v2342_v3 = vsub.f32 1.0, %v2320_v48  ;;  %v2343_v22 = vadd.f32 1e-10, %v2341_v54 }
 0x22e   : > { %v2293_v8 = vmul.f32 %v2288_v51, %v1732_v45  ;;  %v2295_v56 = vmul.f32 %v2288_v51, %v1738_v7  ;;  %v2307_v0 = vmul.f32 %v2305_v53, %v3694_v42  ;;  %v2292_v58 = vrot.slane %v2284_v17, %v3660_v12  ;;  %v3744_v59 = vpop.f32.mrb[78].mxu0  ;;  %v3746_v39 = vpop.f32.mrb[78].mxu1 }
 0x22f   : > { %v2302_v6 = vadd.f32 %v2284_v17, %v3703_v49  ;;  %v2306_v25 = vadd.f32 1e-10, %v2304_v10  ;;  %v3751_v14 = vpop.f32.mrb[79].mxu0  ;;  %v3753_v4 = vpop.f32.mrb[79].mxu1  ;;  %v2344_v28 = vadd.f32 1e-10, %v2342_v3 }
 0x230   : > { %v2297_v5 = vadd.f32 %v2293_v8, %v3707_v55  ;;  %v2299_v42 = vadd.f32 %v2295_v56, %v3709_v9  ;;  %v2321_v13 = vmul.f32 %v2319_v30, %v2307_v0  ;;  %v2294_v15 = vmul.f32 %v2292_v58, %v1734_v1 }
 0x231   : > { %v2296_v18 = vmul.f32 %v2292_v58, %v1740_v61  ;;  %v2308_v49 = vmul.f32 %v2306_v25, %v3696_v46  ;;  %v2345_v46 = vmul.f32 %v2343_v22, %v2307_v0 }
 0x232   : > { %v2326_v19 = vrot.slane %v2321_v13, %v3660_v12  ;;  %v3763_v20 = vadd.f32 %v2321_v13, %v2301_v52  ;;  %v2298_v55 = vadd.f32 %v2294_v15, %v3713_v62  ;;  %v1909_v24 = vpop.f32.mrb[80].mxu0  ;;  %v1992_v9 = vpop.f32.mrb[80].mxu1 }
 0x233   : > { %v2300_v26 = vadd.f32 %v2296_v18, %v3715_v63  ;;  %v2322_v43 = vmul.f32 %v2320_v48, %v2308_v49  ;;  %v1910_v37 = vadd.f32 %v1909_v24, %v3640_v21  ;;  %v1911_v41 = vpop.f32.mrb[81].mxu0  ;;  %v1994_v33 = vpop.f32.mrb[81].mxu1  ;;  %v1993_v36 = vadd.f32 %v1992_v9, %v3640_v21 }
 0x234   : > { %v2331_v30 = vmul.f32 %v2326_v19, %v1815_v47  ;;  %v2333_v34 = vmul.f32 %v2326_v19, %v1821_v27  ;;  %v1912_v62 = vadd.f32 %v1911_v41, %v3640_v21  ;;  %v3775_v51 = vmul.f32 %v2344_v28, %v2308_v49 }
 0x235   : > { %v2330_v38 = vrot.slane %v2322_v43, %v3660_v12  ;;  %v2340_v40 = vadd.f32 %v2322_v43, %v2302_v6  ;;  %v2347_v45 = vmax.f32 %v1910_v37, 0.0  ;;  %v2385_v48 = vmax.f32 %v1993_v36, 0.0 }
 0x236   : > { %v3771_v7 = vadd.f32 %v2331_v30, %v2297_v5  ;;  %v3773_v63 = vadd.f32 %v2333_v34, %v2299_v42  ;;  %v2348_v17 = vmax.f32 %v1912_v62, 0.0  ;;  %v1995_v54 = vadd.f32 %v1994_v33, %v3640_v21 }
 0x237   : > { %v2332_v52 = vmul.f32 %v2330_v38, %v1817_v2  ;;  %v2334_v53 = vmul.f32 %v2330_v38, %v1823_v31  ;;  %v2349_v47 = vsub.f32 0.0, %v2347_v45  ;;  %v2387_v1 = vsub.f32 0.0, %v2385_v48 }
 0x238   : > { %v2350_v0 = vsub.f32 0.0, %v2348_v17  ;;  %v2386_v61 = vmax.f32 %v1995_v54, 0.0  ;;  %v1981_v43 = vadd.f32 %v3724_v60, %v3662_v11  ;;  %v1904_v28 = vadd.f32 %v3744_v59, %v3664_v57 }
 0x239   : > { %v3778_v10 = vadd.f32 %v2332_v52, %v2298_v55  ;;  %v3780_v8 = vadd.f32 %v2334_v53, %v2300_v26  ;;  %v2351_v56 = vmul.f32 %v2349_v47, %v3651_v32  ;;  %v2389_v58 = vmul.f32 %v2387_v1, %v3651_v32 }
 0x23a   : > { %v2352_v25 = vmul.f32 %v2350_v0, %v3654_v35  ;;  %v2388_v3 = vsub.f32 0.0, %v2386_v61  ;;  %v1898_v26 = vadd.f32 %v3722_v44, %v3662_v11  ;;  %v3801_v33 = vmul.f32 10.0, %v3642_v23 }
 0x23b   : > { %v2353_v6 = vmul.f32 1.442695, %v2351_v56  ;;  %v2391_v2 = vmul.f32 1.442695, %v2389_v58  ;;  %v1900_v60 = vadd.f32 %v3732_v16, %v3662_v11 }
 0x23c   : > { %v2355_v5 = vmul.f32 1.442695, %v2352_v25  ;;  %v2390_v42 = vmul.f32 %v2388_v3, %v3654_v35  ;;  %v1983_v25 = vadd.f32 %v3734_v50, %v3662_v11 }
 0x23d   : > { %2930 = vpow2.f32 %v2353_v6 }
 0x23e   : > { %2932 = vpow2.f32 %v2391_v2  ;;  %v2393_v13 = vmul.f32 1.442695, %v2390_v42  ;;  %v1987_v2 = vadd.f32 %v3746_v39, %v3664_v57 }
 0x23f   : > { %2934 = vpow2.f32 %v2355_v5 }
 0x240   : > { %2936 = vpow2.f32 %v2393_v13 }
 0x247   : > { %v2931_v15 = vpop.eup %2930 }
 0x248   : > { %v2933_v27 = vpop.eup %2932  ;;  %v2357_v31 = vsub.f32 1.0, %v2931_v15 }
 0x249   : > { %v2935_v18 = vpop.eup %2934  ;;  %v2395_v49 = vsub.f32 1.0, %v2933_v27 }
 0x24a   : > { %v2359_v19 = vmul.f32 %v2357_v31, %v2345_v46  ;;  %v2379_v22 = vsub.f32 1.0, %v2357_v31  ;;  %v2358_v55 = vsub.f32 1.0, %v2935_v18  ;;  %v3786_v24 = vpop.f32.mrb[82].mxu0  ;;  %v3788_v9 = vpop.f32.mrb[82].mxu1 }
 0x24b   : > { %v3796_v37 = vpop.f32.mrb[83].mxu0  ;;  %v3798_v41 = vpop.f32.mrb[83].mxu1  ;;  %v2417_v45 = vsub.f32 1.0, %v2395_v49 }
 0x24c   : > { %v2937_v30 = vpop.eup %2936  ;;  %v2364_v34 = vrot.slane %v2359_v19, %v3660_v12  ;;  %v2377_v36 = vadd.f32 %v2359_v19, %v3763_v20  ;;  %v2381_v38 = vadd.f32 1e-10, %v2379_v22  ;;  %v2360_v44 = vmul.f32 %v2358_v55, %v3775_v51 }
 0x24d   : > { %v2380_v59 = vsub.f32 1.0, %v2358_v55  ;;  %v2396_v62 = vsub.f32 1.0, %v2937_v30  ;;  %v1906_v20 = vadd.f32 %v3751_v14, %v3664_v57  ;;  %v2419_v42 = vadd.f32 1e-10, %v2417_v45 }
 0x24e   : > { %v2369_v48 = vmul.f32 %v2364_v34, %v1898_v26  ;;  %v2371_v52 = vmul.f32 %v2364_v34, %v1904_v28  ;;  %v2383_v53 = vmul.f32 %v2381_v38, %v2345_v46  ;;  %v2368_v23 = vrot.slane %v2360_v44, %v3660_v12  ;;  %v3809_v47 = vpop.f32.mrb[84].mxu0  ;;  %v3811_v17 = vpop.f32.mrb[84].mxu1 }
 0x24f   : > { %v2378_v1 = vadd.f32 %v2360_v44, %v2340_v40  ;;  %v2382_v54 = vadd.f32 1e-10, %v2380_v59  ;;  %v2418_v56 = vsub.f32 1.0, %v2396_v62  ;;  %v3815_v0 = vpop.f32.mrb[85].mxu0  ;;  %v3817_v16 = vpop.f32.mrb[85].mxu1 }
 0x250   : > { %v2373_v58 = vadd.f32 %v2369_v48, %v3771_v7  ;;  %v2375_v46 = vadd.f32 %v2371_v52, %v3773_v63  ;;  %v2397_v61 = vmul.f32 %v2395_v49, %v2383_v53  ;;  %v2370_v6 = vmul.f32 %v2368_v23, %v1900_v60 }
 0x251   : > { %v2372_v14 = vmul.f32 %v2368_v23, %v1906_v20  ;;  %v2384_v40 = vmul.f32 %v2382_v54, %v3775_v51  ;;  %v1989_v63 = vadd.f32 %v3753_v4, %v3664_v57  ;;  %v2420_v31 = vadd.f32 1e-10, %v2418_v56 }
 0x252   : > { %v2402_v3 = vrot.slane %v2397_v61, %v3660_v12  ;;  %v2415_v5 = vadd.f32 %v2397_v61, %v2377_v36  ;;  %v2374_v13 = vadd.f32 %v2370_v6, %v3778_v10  ;;  %v2075_v7 = vpop.f32.mrb[86].mxu0  ;;  %v2158_v15 = vpop.f32.mrb[86].mxu1  ;;  %v2421_v22 = vmul.f32 %v2419_v42, %v2383_v53 }
 0x253   : > { %v2376_v27 = vadd.f32 %v2372_v14, %v3780_v8  ;;  %v2398_v50 = vmul.f32 %v2396_v62, %v2384_v40  ;;  %v2077_v18 = vpop.f32.mrb[87].mxu0  ;;  %v2160_v39 = vpop.f32.mrb[87].mxu1  ;;  %v2076_v51 = vadd.f32 %v2075_v7, %v3640_v21  ;;  %v2159_v10 = vadd.f32 %v2158_v15, %v3640_v21 }
 0x254   : > { %v2407_v49 = vmul.f32 %v2402_v3, %v1981_v43  ;;  %v2409_v19 = vmul.f32 %v2402_v3, %v1987_v2  ;;  %v2078_v28 = vadd.f32 %v2077_v18, %v3640_v21  ;;  %v2422_v8 = vmul.f32 %v2420_v31, %v2384_v40 }
 0x255   : > { %v2406_v55 = vrot.slane %v2398_v50, %v3660_v12  ;;  %v2416_v26 = vadd.f32 %v2398_v50, %v2378_v1  ;;  %v2423_v34 = vmax.f32 %v2076_v51, 0.0  ;;  %v2463_v44 = vmax.f32 %v2159_v10, 0.0 }
 0x256   : > { %v2411_v30 = vadd.f32 %v2407_v49, %v2373_v58  ;;  %v2413_v4 = vadd.f32 %v2409_v19, %v2375_v46  ;;  %v2424_v60 = vmax.f32 %v2078_v28, 0.0  ;;  %v2161_v45 = vadd.f32 %v2160_v39, %v3640_v21 }
 0x257   : > { %v2408_v36 = vmul.f32 %v2406_v55, %v1983_v25  ;;  %v2410_v38 = vmul.f32 %v2406_v55, %v1989_v63  ;;  %v2425_v43 = vsub.f32 0.0, %v2423_v34  ;;  %v2465_v48 = vsub.f32 0.0, %v2463_v44 }
 0x258   : > { %v2426_v52 = vsub.f32 0.0, %v2424_v60  ;;  %v2462_v23 = vmul.f32 10.0, %v3646_v29  ;;  %v2464_v20 = vmax.f32 %v2161_v45, 0.0  ;;  %v2070_v3 = vadd.f32 %v3809_v47, %v3664_v57 }
 0x259   : > { %v2412_v59 = vadd.f32 %v2408_v36, %v2374_v13  ;;  %v2414_v62 = vadd.f32 %v2410_v38, %v2376_v27  ;;  %v2427_v53 = vmul.f32 %v2425_v43, %v3651_v32  ;;  %v2467_v1 = vmul.f32 %v2465_v48, %v3801_v33 }
 0x25a   : > { %v2428_v54 = vmul.f32 %v2426_v52, %v3654_v35  ;;  %v2466_v58 = vsub.f32 0.0, %v2464_v20  ;;  %v2064_v35 = vadd.f32 %v3786_v24, %v3662_v11  ;;  %v2066_v63 = vadd.f32 %v3796_v37, %v3662_v11 }
 0x25b   : > { %v2429_v56 = vmul.f32 1.442695, %v2427_v53  ;;  %v2469_v46 = vmul.f32 1.442695, %v2467_v1  ;;  %v2072_v47 = vadd.f32 %v3815_v0, %v3664_v57  ;;  %v2147_v37 = vadd.f32 %v3788_v9, %v3662_v11 }
 0x25c   : > { %v2431_v61 = vmul.f32 1.442695, %v2428_v54  ;;  %v2468_v6 = vmul.f32 %v2466_v58, %v2462_v23  ;;  %v2149_v9 = vadd.f32 %v3798_v41, %v3662_v11 }
 0x25d   : > { %2938 = vpow2.f32 %v2429_v56 }
 0x25e   : > { %2940 = vpow2.f32 %v2431_v61  ;;  %v2471_v21 = vmul.f32 1.442695, %v2468_v6 }
 0x25f   : > { %2942 = vpow2.f32 %v2469_v46 }
 0x260   : > { %2944 = vpow2.f32 %v2471_v21 }
 0x267   : > { %v2939_v25 = vpop.eup %2938 }
 0x268   : > { %v2433_v2 = vsub.f32 1.0, %v2939_v25  ;;  %v2941_v32 = vpop.eup %2940 }
 0x269   : > { %v2943_v14 = vpop.eup %2942  ;;  %v2434_v33 = vsub.f32 1.0, %v2941_v32 }
 0x26a   : > { %v2435_v29 = vmul.f32 %v2433_v2, %v2421_v22  ;;  %v2455_v40 = vsub.f32 1.0, %v2433_v2  ;;  %v2473_v27 = vsub.f32 1.0, %v2943_v14  ;;  %v2945_v31 = vpop.eup %2944 }
 0x26b   : > { %v2436_v15 = vmul.f32 %v2434_v33, %v2422_v8  ;;  %v2456_v50 = vsub.f32 1.0, %v2434_v33  ;;  %v2474_v38 = vsub.f32 1.0, %v2945_v31 }
 0x26c   : > { %v2440_v42 = vrot.slane %v2435_v29, %v3660_v12  ;;  %v2453_v13 = vadd.f32 %v2435_v29, %v2415_v5  ;;  %v2457_v7 = vadd.f32 1e-10, %v2455_v40 }
 0x26d   : > { %v2444_v24 = vrot.slane %v2436_v15, %v3660_v12  ;;  %v2454_v19 = vadd.f32 %v2436_v15, %v2416_v26  ;;  %v2458_v5 = vadd.f32 1e-10, %v2456_v50 }
 0x26e   : > { %v2445_v18 = vmul.f32 %v2440_v42, %v2064_v35  ;;  %v2447_v39 = vmul.f32 %v2440_v42, %v2070_v3  ;;  %v2459_v49 = vmul.f32 %v2457_v7, %v2421_v22  ;;  %v2153_v22 = vadd.f32 %v3811_v17, %v3664_v57 }
 0x26f   : > { %v2446_v28 = vmul.f32 %v2444_v24, %v2066_v63  ;;  %v2448_v34 = vmul.f32 %v2444_v24, %v2072_v47  ;;  %v2460_v36 = vmul.f32 %v2458_v5, %v2422_v8  ;;  %v2155_v8 = vadd.f32 %v3817_v16, %v3664_v57 }
 0x270   : > { %v2449_v51 = vadd.f32 %v2445_v18, %v2411_v30  ;;  %v2451_v55 = vadd.f32 %v2447_v39, %v2413_v4  ;;  %v2475_v10 = vmul.f32 %v2473_v27, %v2459_v49 }
 0x271   : > { %v2450_v26 = vadd.f32 %v2446_v28, %v2412_v59  ;;  %v2452_v30 = vadd.f32 %v2448_v34, %v2414_v62  ;;  %v2476_v4 = vmul.f32 %v2474_v38, %v2460_v36 }
 0x272   : > { %v2480_v44 = vrot.slane %v2475_v10, %v3660_v12  ;;  %v2493_v0 = vadd.f32 %v2475_v10, %v2453_v13 }
 0x273   : > { %v2484_v48 = vrot.slane %v2476_v4, %v3660_v12  ;;  %v2494_v52 = vadd.f32 %v2476_v4, %v2454_v19 }
 0x274   : > { %v2485_v60 = vmul.f32 %v2480_v44, %v2147_v37  ;;  %v2487_v43 = vmul.f32 %v2480_v44, %v2153_v22  ;;  %v2495_v45 = vsub.f32 1.0, %v2493_v0 }
 0x275   : > { %v2486_v59 = vmul.f32 %v2484_v48, %v2149_v9  ;;  %v2488_v20 = vmul.f32 %v2484_v48, %v2155_v8  ;;  %v2496_v62 = vsub.f32 1.0, %v2494_v52 }
 0x276   : > { %v2489_v17 = vadd.f32 %v2485_v60, %v2449_v51  ;;  %v2491_v53 = vadd.f32 %v2487_v43, %v2451_v55  ;;  %v2500_v23 = vrot.slane %v2495_v45, %v3660_v12 }
 0x277   : > { %v2490_v41 = vadd.f32 %v2486_v59, %v2450_v26  ;;  %v2492_v54 = vadd.f32 %v2488_v20, %v2452_v30  ;;  %v2504_v57 = vrot.slane %v2496_v62, %v3660_v12 }
 0x278   : > { %v2505_v1 = vadd.f32 %v2500_v23, %v2489_v17  ;;  %v2507_v11 = vadd.f32 %v2500_v23, %v2491_v53 }
 0x279   : > { %v2506_v16 = vadd.f32 %v2504_v57, %v2490_v41  ;;  %v2508_v56 = vadd.f32 %v2504_v57, %v2492_v54 }
 0x27a   : > { %2509 = vst [vmem:[%s274_s11] sm:$0xff] %v2505_v1  ;;  %2511 = vst [vmem:[%s274_s11 + $0x10] sm:$0xff] %v2507_v11 }
 0x27b   : > { %2510 = vst [vmem:[%s274_s11 + $0x8] sm:$0xff] %v2506_v16  ;;  %2512 = vst [vmem:[%s274_s11 + $0x18] sm:$0xff] %v2508_v56 }
 0x27c   : > { %2959 = shalt.err (!%p2956_p3)
}
 0x27d   : > { %s2960_s20 = scalar_lea.hbm %s3869_s15, 512  ;;  %s2964_s9 = scalar_lea.hbm %s3922_s6, 1024 }
 0x27e   : > { %p2961_p4 = scmp.ne.s32.totalorder %s3869_s15, %s2960_s20  ;;  %p2965_p9 = scmp.lt.u32.totalorder %s3869_s15, %s3922_s6 }
 0x27f   : > { %p2966_p10 = scmp.lt.u32.totalorder %s2964_s9, %s2960_s20  ;;  %p2968_p12 = scmp.lt.u32.totalorder %s2960_s20, %s3869_s15 }
 0x280   : > { %p2962_p7 = pnand %p2961_p4, %p3088_p5 }
 0x281   : > { %p2967_p11 = por %p2966_p10, %p2965_p9 }
 0x282   : > { %p2963_p8 = pneg %p2962_p7 }
 0x283   : > { %p2969_p13 = por %p2968_p12, %p2967_p11 }
 0x285   : > { %p2970_p0 = pnand %p2969_p13, %p2963_p8 }
 0x287   : > { %2973 = shalt.err (!%p2970_p0)
}
 0x288   : > { %s3013_s11 = smov 256   ;;  %s3014_s13 = smov 16  }
 0x289   : > { %2865 = dma.vmem_to_hbm [thread:$0]  (%p3088_p5), %s3871_s12, 512, %s3869_s15, %s3875_s25, %s3013_s11, %s3013_s11, %s3014_s13  }
 0x28a PF: > { %p2871_p1 = scmp.ge.s32.totalorder %s3008_s24, 2  ;;  %s2542_s14 = sand.u32 1, %s2996_s21  }
 0x28b   : > { %s2543_s16 = scalar_lea.sflag [#allocation3], %s2542_s14 }
 0x28c   : > { %p2868_p2 = pnand %p2871_p1, %p3092_p6 }
 0x28e   : > { %2991 = dma.done.wait (!%p2868_p2), %s2543_s16, 512  }
 0x28f   : > { %2993 = vsyncadd (!%p2868_p2), %s2543_s16, 4294966784  ;;  %p16_p3 = scmp.ge.s32.totalorder %s3075_s27, 4   ;;  %s3925_s21 = smov %s3000_s22 }
 0x290   : > { %s3926_s22 = smov %s3004_s23  ;;  %s3927_s23 = smov %s3086_s30 }
 0x291   : > { %s3928_s24 = smov %s3075_s27  ;;  %18 = sbr.rel (!%p16_p3) target bundleno = 3 (0x3), region = 85 }
 0x298   :  { %2548 = vsyncpa [#allocation3], 1 }
 0x299   :  { %2550 = vsyncpa [#allocation3 + $0x1], 1 }

</bundles_post_ra>
